<compile_context>
chip_gen: v6e
topology: v6e:2x2x1
jax: 0.10.0
libtpu: 0.0.40
codegen_flags: <defaults>
</compile_context>

<pallas_src>
import jax
import jax.numpy as jnp
from jax.experimental import pallas as pl
from jax.experimental.pallas import tpu as pltpu

NEG_INF = -1.0e9


# ---------------------------------------------------------------------------
# Helpers
# ---------------------------------------------------------------------------

def _round_up(n, m):
    return -(-n // m) * m


def _vmem_budget_bytes():
    """Generation-aware VMEM budget: ~1/4 of physical capacity, >= 8 MiB."""
    try:
        cap = int(pltpu.get_tpu_info().vmem_capacity_bytes)
    except Exception:
        cap = 64 << 20  # conservative (v7x physical)
    return max(8 << 20, cap // 4)


def _choose_block_b(B, S, H, itemsize):
    """Batch-block size: ~512 MLP rows/step, multiple of 16, VMEM- and megacore-aware."""
    bb = _round_up(max(16, pl.cdiv(512, S)), 16)
    # Double-buffered x block dominates the footprint.
    cap_rows = _vmem_budget_bytes() // max(1, 2 * S * H * itemsize)
    bb = min(bb, max(16, (cap_rows // 16) * 16))
    # v7x has 2 TensorCores; the "parallel" batch axis shards across them, so keep
    # at least two grid steps whenever the batch is big enough to split.
    if B > 16:
        bb = min(bb, _round_up(pl.cdiv(B, 2), 16))
    return int(min(bb, max(16, _round_up(B, 16))))


# ---------------------------------------------------------------------------
# Kernels: one grid step == one block of batch rows.
# ---------------------------------------------------------------------------

def _attflat_att(x_ref, mb_ref, w1_ref, b1_ref, w2_ref, b2_ref):
    """Shared MLP + masked softmax.  Returns (x_f32, att_sm) for one batch block."""
    Bb, S, H = x_ref.shape
    G = w2_ref.shape[1]

    x = x_ref[...].astype(jnp.float32)                       # (Bb, S, H), per-block cast
    # S is padded to a multiple of 8 by the wrapper, so this leading-dim merge is
    # relayout-free.
    x2 = x.reshape(Bb * S, H)

    # MLP: Linear(H->FF) + ReLU + Linear(FF->G); f32 accumulation on the MXU.
    h = jnp.dot(x2, w1_ref[...].astype(jnp.float32),
                preferred_element_type=jnp.float32) + b1_ref[...]
    h = jnp.maximum(h, 0.0)
    att = jnp.dot(h, w2_ref[...].astype(jnp.float32),
                  preferred_element_type=jnp.float32) + b2_ref[...]   # (Bb*S, G)

    # masked_fill(mask, -1e9) as a single additive bias (see correctness notes).
    att = att.reshape(Bb, S, G) + mb_ref[...][:, :, None]

    # softmax over the sequence axis (dim=1 in PyTorch), f32 throughout.
    att = att - jnp.max(att, axis=1, keepdims=True)
    e = jnp.exp(att)
    inv = 1.0 / jnp.sum(e, axis=1, keepdims=True)            # tiny (Bb,1,G) divide
    return x, e * inv


def _attflat_kernel(x_ref, mb_ref, w1_ref, b1_ref, w2_ref, b2_ref, out_ref):
    x, att_sm = _attflat_att(x_ref, mb_ref, w1_ref, b1_ref, w2_ref, b2_ref)
    Bb, S, H = x.shape
    G = att_sm.shape[-1]
    # Two batch rows per packed output row -> single lane-dense (Bb//2, 2*G*H) store.
    # Leading-dim splits below are free (minor (S,H) / (S,G) dims untouched).
    x2 = x.reshape(Bb // 2, 2, S, H)
    a2 = att_sm.reshape(Bb // 2, 2, S, G)
    pieces = []
    for p in range(2):                         # even / odd batch rows of the pair
        for g in range(G):                     # glimpses, unrolled (G is tiny)
            # out[b, g, :] = sum_s att[b, s, g] * x[b, s, :]  (VPU mul + sublane reduce)
            pieces.append(jnp.sum(a2[:, p, :, g:g + 1] * x2[:, p], axis=1))
    out_ref[...] = jnp.concatenate(pieces, axis=-1).astype(out_ref.dtype)


def _attflat_merge_kernel(x_ref, mb_ref, w1_ref, b1_ref, w2_ref, b2_ref,
                          wm_ref, bm_ref, out_ref):
    x, att_sm = _attflat_att(x_ref, mb_ref, w1_ref, b1_ref, w2_ref, b2_ref)
    Bb, S, H = x.shape
    G = att_sm.shape[-1]
    H2 = wm_ref.shape[-1]
    x2 = x.reshape(Bb // 2, 2, S, H)
    a2 = att_sm.reshape(Bb // 2, 2, S, G)
    bm = bm_ref[...].astype(jnp.float32)
    halves = []
    for p in range(2):                         # even / odd batch rows of the pair
        acc = jnp.zeros((Bb // 2, H2), jnp.float32)
        for g in range(G):                     # linear_merge contracted per glimpse
            og = jnp.sum(a2[:, p, :, g:g + 1] * x2[:, p], axis=1)       # (Bb/2, H)
            acc = acc + jnp.dot(og, wm_ref[g].astype(jnp.float32),
                                preferred_element_type=jnp.float32)
        halves.append(acc + bm)
    out_ref[...] = jnp.concatenate(halves, axis=-1).astype(out_ref.dtype)


# ---------------------------------------------------------------------------
# Wrapper
# ---------------------------------------------------------------------------

def attflat_pallas(x, x_mask, params, *, merge=False, block_b=None):
    """AttFlat forward.  x: (B, S, H); x_mask: (B, 1, 1, S) bool or None.

    Returns (B, G, H) for merge=False, (B, 2H) for merge=True (matches PyTorch).
    """
    B, S, H = x.shape
    FF = params["w1"].shape[1]
    G = params["w2"].shape[1]
    out_dtype = x.dtype

    # (B,1,1,S) bool -> (B,S) additive bias: 0 keep / -1e9 masked.  (Tiny vs x.)
    if x_mask is None:
        mb = jnp.zeros((B, S), jnp.float32)
    else:
        mb = x_mask.reshape(B, S).astype(jnp.float32) * jnp.float32(NEG_INF)

    # Keep S a multiple of 8 so the in-kernel (Bb,S,H)->(Bb*S,H) merge stays
    # relayout-free; padded positions are hard-masked (zero softmax weight).
    Sp = _round_up(S, 8)
    if Sp != S:
        x = jnp.pad(x, ((0, 0), (0, Sp - S), (0, 0)))
        mb = jnp.pad(mb, ((0, 0), (0, Sp - S)), constant_values=NEG_INF)
        S = Sp

    if block_b is None:
        block_b = _choose_block_b(B, S, H, x.dtype.itemsize)
    block_b = max(16, _round_up(int(block_b), 16))   # packed out block needs Bb % 16 == 0

    # Tiny batches: pad up to one block (negligible).  Larger batches use a cdiv
    # grid; the partial last input block's garbage tail is safe because all ops are
    # batch-row independent and those rows' outputs are sliced off below.
    Bq = B
    if Bq < block_b:
        block_b = max(16, _round_up(Bq, 16))
        if block_b > Bq:
            x = jnp.pad(x, ((0, block_b - Bq), (0, 0), (0, 0)))
            mb = jnp.pad(mb, ((0, block_b - Bq), (0, 0)))
            Bq = block_b

    nblk = pl.cdiv(Bq, block_b)
    Bp = nblk * block_b
    grid = (nblk,)

    H2 = params["wm"].shape[1] if merge else 0
    out_cols = 2 * (H2 if merge else G * H)          # two batch rows per output row

    in_specs = [
        pl.BlockSpec((block_b, S, H), lambda b: (b, 0, 0)),   # x
        pl.BlockSpec((block_b, S), lambda b: (b, 0)),         # additive mask bias
        pl.BlockSpec((H, FF), lambda b: (0, 0)),              # w1
        pl.BlockSpec((1, FF), lambda b: (0, 0)),              # b1
        pl.BlockSpec((FF, G), lambda b: (0, 0)),              # w2
        pl.BlockSpec((1, G), lambda b: (0, 0)),               # b2
    ]

    # Advisory cost estimate (lets XLA overlap this small call with neighbours).
    wbytes = 4 * (H * FF + FF + FF * G + G)
    flops = 2 * Bp * S * (H * FF + FF * G) + 2 * Bp * S * G * H
    if merge:
        wbytes += 4 * (G * H * H2 + H2)
        flops += 2 * Bp * G * H * H2
    out_bytes = (Bp // 2) * out_cols * x.dtype.itemsize
    cost = pl.CostEstimate(
        flops=flops,
        transcendentals=Bp * S * G,
        bytes_accessed=Bp * S * H * x.dtype.itemsize + Bp * S * 4 + wbytes + out_bytes)

    # VMEM: double-buffered x + mask + packed out blocks + weights, with headroom,
    # clamped to the generation-aware budget (safe on v7x's 64 MiB physical VMEM).
    est_vmem = 2 * (block_b * S * (H * x.dtype.itemsize + 4)
                    + (block_b // 2) * out_cols * x.dtype.itemsize) + 2 * wbytes
    vmem_limit = int(min(_vmem_budget_bytes(), max(8 << 20, 4 * est_vmem)))
    compiler_params = pltpu.CompilerParams(
        dimension_semantics=("parallel",), vmem_limit_bytes=vmem_limit)

    if not merge:
        out = pl.pallas_call(
            _attflat_kernel,
            out_shape=jax.ShapeDtypeStruct((Bp // 2, 2 * G * H), out_dtype),
            grid=grid,
            in_specs=in_specs,
            out_specs=pl.BlockSpec((block_b // 2, 2 * G * H), lambda b: (b, 0)),
            compiler_params=compiler_params,
            cost_estimate=cost,
        )(x, mb, params["w1"], params["b1"], params["w2"], params["b2"])
        # Free wrapper-side unpack of the row-pair packing, then drop padded rows.
        return out.reshape(Bp, G, H)[:B]

    wm = params["wm"].reshape(G, H, H2)              # row g*H+h -> [g, h, :]
    out = pl.pallas_call(
        _attflat_merge_kernel,
        out_shape=jax.ShapeDtypeStruct((Bp // 2, 2 * H2), out_dtype),
        grid=grid,
        in_specs=in_specs + [
            pl.BlockSpec((G, H, H2), lambda b: (0, 0, 0)),    # wm (per-glimpse slices)
            pl.BlockSpec((1, H2), lambda b: (0, 0)),          # bm
        ],
        out_specs=pl.BlockSpec((block_b // 2, 2 * H2), lambda b: (b, 0)),
        compiler_params=compiler_params,
        cost_estimate=cost,
    )(x, mb, params["w1"], params["b1"], params["w2"], params["b2"], wm, params["bm"])
    return out.reshape(Bp, H2)[:B]


# ---------------------------------------------------------------------------
# Pure-JAX reference (mirrors the PyTorch forward exactly, f32)
# ---------------------------------------------------------------------------

def attflat_ref(x, x_mask, params, *, merge=False):
    B, S, H = x.shape
    h = jnp.maximum(x @ params["w1"] + params["b1"][0], 0.0)
    att = h @ params["w2"] + params["b2"][0]                 # (B, S, G)
    if x_mask is not None:
        att = jnp.where(x_mask.reshape(B, S, 1), jnp.float32(NEG_INF), att)
    att = jax.nn.softmax(att, axis=1)
    out = jnp.einsum("bsg,bsh->bgh", att, x)                 # (B, G, H)
    if merge:
        return out.reshape(B, -1) @ params["wm"] + params["bm"][0]
    return out


# ---------------------------------------------------------------------------
# Main
# ---------------------------------------------------------------------------

if __name__ == "__main__":
    # Shapes consistent with the module: hidden_size=32, ff_size=64, flat_glimpse=2.
    B, S, H, FF, G = 48, 8, 32, 64, 2
    H2 = 2 * H

    key = jax.random.PRNGKey(0)
    k = jax.random.split(key, 8)
    params = {
        # nn.Linear weights stored already transposed: (in, out)
        "w1": 0.1 * jax.random.normal(k[0], (H, FF), jnp.float32),
        "b1": 0.1 * jax.random.normal(k[1], (1, FF), jnp.float32),
        "w2": 0.1 * jax.random.normal(k[2], (FF, G), jnp.float32),
        "b2": 0.1 * jax.random.normal(k[3], (1, G), jnp.float32),
        "wm": 0.1 * jax.random.normal(k[4], (G * H, H2), jnp.float32),
        "bm": 0.1 * jax.random.normal(k[5], (1, H2), jnp.float32),
    }
    x = jax.random.normal(k[6], (B, S, H), jnp.float32)
    # Boolean key-padding mask (B,1,1,S): mask last 3 positions of every other row.
    x_mask = jnp.zeros((B, 1, 1, S), dtype=jnp.bool_).at[1::2, 0, 0, S - 3:].set(True)

    for merge in (False, True):
        ref = attflat_ref(x, x_mask, params, merge=merge)

        # Auto block size (block_b=32 here -> 2 grid steps, partial last input block).
        out = jax.block_until_ready(attflat_pallas(x, x_mask, params, merge=merge))
        assert out.shape == ref.shape
        assert jnp.allclose(out, ref, rtol=1e-4, atol=1e-4), f"auto mismatch merge={merge}"

        # Explicit small block (exact divisibility, 3 grid steps).
        out16 = jax.block_until_ready(
            attflat_pallas(x, x_mask, params, merge=merge, block_b=16))
        assert jnp.allclose(out16, ref, rtol=1e-4, atol=1e-4), f"bb16 mismatch merge={merge}"

    # No-mask path.
    ref_nm = attflat_ref(x, None, params, merge=False)
    out_nm = jax.block_until_ready(attflat_pallas(x, None, params, merge=False))
    assert jnp.allclose(out_nm, ref_nm, rtol=1e-4, atol=1e-4), "no-mask mismatch"

    # Odd tiny batch (exercises the tiny-batch padding fallback).
    Bo = 3
    xo = jax.random.normal(k[7], (Bo, S, H), jnp.float32)
    mo = jnp.zeros((Bo, 1, 1, S), dtype=jnp.bool_).at[0, 0, 0, S - 2:].set(True)
    for merge in (False, True):
        refo = attflat_ref(xo, mo, params, merge=merge)
        outo = jax.block_until_ready(attflat_pallas(xo, mo, params, merge=merge))
        assert outo.shape == refo.shape
        assert jnp.allclose(outo, refo, rtol=1e-4, atol=1e-4), f"odd-batch mismatch merge={merge}"

    print("KERNEL_OK")
</pallas_src>

<mosaic_0001>
module attributes {stable_mosaic.version = 11 : i64} {
  func.func @_attflat_kernel(%arg0: i32, %arg1: memref<32x8x32xf32, #tpu.memory_space<vmem>>, %arg2: memref<32x8xf32, #tpu.memory_space<vmem>>, %arg3: memref<32x64xf32, #tpu.memory_space<vmem>>, %arg4: memref<1x64xf32, #tpu.memory_space<vmem>>, %arg5: memref<64x2xf32, #tpu.memory_space<vmem>>, %arg6: memref<1x2xf32, #tpu.memory_space<vmem>>, %arg7: memref<16x128xf32, #tpu.memory_space<vmem>>) attributes {dimension_semantics = [#tpu.dimension_semantics<parallel>], iteration_bounds = array<i64: 2>, scalar_prefetch = 0 : i64, scratch_operands = 0 : i64, tpu.core_type = #tpu.core_type<tc>, window_params = [{transform_indices = @transform_0, window_bounds = array<i64: 32, 8, 32>}, {transform_indices = @transform_1, window_bounds = array<i64: 32, 8>}, {pipeline_mode = #tpu.pipeline_mode<synchronous>, transform_indices = @transform_2, window_bounds = array<i64: 32, 64>}, {pipeline_mode = #tpu.pipeline_mode<synchronous>, transform_indices = @transform_3, window_bounds = array<i64: 1, 64>}, {pipeline_mode = #tpu.pipeline_mode<synchronous>, transform_indices = @transform_4, window_bounds = array<i64: 64, 2>}, {pipeline_mode = #tpu.pipeline_mode<synchronous>, transform_indices = @transform_5, window_bounds = array<i64: 1, 2>}, {transform_indices = @transform_6, window_bounds = array<i64: 16, 128>}]} {
    %c0 = arith.constant 0 : index
    %c0_0 = arith.constant 0 : index
    %c0_1 = arith.constant 0 : index
    %0 = vector.load %arg1[%c0, %c0_0, %c0_1] : memref<32x8x32xf32, #tpu.memory_space<vmem>>, vector<32x8x32xf32>
    %1 = vector.shape_cast %0 : vector<32x8x32xf32> to vector<256x32xf32>
    %c0_2 = arith.constant 0 : index
    %c0_3 = arith.constant 0 : index
    %2 = vector.load %arg3[%c0_2, %c0_3] : memref<32x64xf32, #tpu.memory_space<vmem>>, vector<32x64xf32>
    %cst = arith.constant dense<0.000000e+00> : vector<256x64xf32>
    %3 = tpu.matmul %1, %2, %cst {dimension_numbers = #tpu.dot_dimension_numbers<[1], [0], [0], [1], [0, 0, 1, 1], [], []>} : vector<256x32xf32>, vector<32x64xf32>, vector<256x64xf32> -> vector<256x64xf32>
    %c0_4 = arith.constant 0 : index
    %c0_5 = arith.constant 0 : index
    %4 = vector.load %arg4[%c0_4, %c0_5] : memref<1x64xf32, #tpu.memory_space<vmem>>, vector<1x64xf32>
    %5 = vector.broadcast %4 : vector<1x64xf32> to vector<256x64xf32>
    %6 = arith.addf %3, %5 : vector<256x64xf32>
    %cst_6 = arith.constant 0.000000e+00 : f32
    %7 = vector.broadcast %cst_6 : f32 to vector<256x64xf32>
    %8 = arith.maximumf %6, %7 : vector<256x64xf32>
    %c0_7 = arith.constant 0 : index
    %c0_8 = arith.constant 0 : index
    %9 = vector.load %arg5[%c0_7, %c0_8] : memref<64x2xf32, #tpu.memory_space<vmem>>, vector<64x2xf32>
    %cst_9 = arith.constant dense<0.000000e+00> : vector<256x2xf32>
    %10 = tpu.matmul %8, %9, %cst_9 {dimension_numbers = #tpu.dot_dimension_numbers<[1], [0], [0], [1], [0, 0, 1, 1], [], []>} : vector<256x64xf32>, vector<64x2xf32>, vector<256x2xf32> -> vector<256x2xf32>
    %c0_10 = arith.constant 0 : index
    %c0_11 = arith.constant 0 : index
    %11 = vector.load %arg6[%c0_10, %c0_11] : memref<1x2xf32, #tpu.memory_space<vmem>>, vector<1x2xf32>
    %12 = vector.broadcast %11 : vector<1x2xf32> to vector<256x2xf32>
    %13 = arith.addf %10, %12 : vector<256x2xf32>
    %14 = vector.shape_cast %13 : vector<256x2xf32> to vector<32x8x2xf32>
    %c0_12 = arith.constant 0 : index
    %c0_13 = arith.constant 0 : index
    %15 = vector.load %arg2[%c0_12, %c0_13] : memref<32x8xf32, #tpu.memory_space<vmem>>, vector<32x8xf32>
    %16 = vector.shape_cast %15 : vector<32x8xf32> to vector<32x8x1xf32>
    %17 = vector.broadcast %16 : vector<32x8x1xf32> to vector<32x8x2xf32>
    %18 = arith.addf %14, %17 : vector<32x8x2xf32>
    %cst_14 = arith.constant dense<0xFF800000> : vector<32x2xf32>
    %19 = vector.multi_reduction <maximumf>, %18, %cst_14 [1] : vector<32x8x2xf32> to vector<32x2xf32>
    %20 = vector.shape_cast %19 : vector<32x2xf32> to vector<32x1x2xf32>
    %21 = vector.broadcast %20 : vector<32x1x2xf32> to vector<32x8x2xf32>
    %22 = arith.subf %18, %21 : vector<32x8x2xf32>
    %23 = math.exp %22 : vector<32x8x2xf32>
    %cst_15 = arith.constant dense<0.000000e+00> : vector<32x2xf32>
    %24 = vector.multi_reduction <add>, %23, %cst_15 [1] : vector<32x8x2xf32> to vector<32x2xf32>
    %25 = vector.shape_cast %24 : vector<32x2xf32> to vector<32x1x2xf32>
    %cst_16 = arith.constant 1.000000e+00 : f32
    %26 = vector.broadcast %cst_16 : f32 to vector<32x1x2xf32>
    %27 = arith.divf %26, %25 : vector<32x1x2xf32>
    %28 = vector.broadcast %27 : vector<32x1x2xf32> to vector<32x8x2xf32>
    %29 = arith.mulf %23, %28 : vector<32x8x2xf32>
    %30 = vector.shape_cast %0 : vector<32x8x32xf32> to vector<16x2x8x32xf32>
    %31 = vector.shape_cast %29 : vector<32x8x2xf32> to vector<16x2x8x2xf32>
    %32 = vector.extract_strided_slice %31 {offsets = [0, 0, 0, 0], sizes = [16, 1, 8, 1], strides = [1, 1, 1, 1]} : vector<16x2x8x2xf32> to vector<16x1x8x1xf32>
    %33 = vector.shape_cast %32 : vector<16x1x8x1xf32> to vector<16x8x1xf32>
    %34 = vector.extract_strided_slice %30 {offsets = [0, 0, 0, 0], sizes = [16, 1, 8, 32], strides = [1, 1, 1, 1]} : vector<16x2x8x32xf32> to vector<16x1x8x32xf32>
    %35 = vector.shape_cast %34 : vector<16x1x8x32xf32> to vector<16x8x32xf32>
    %36 = vector.broadcast %33 : vector<16x8x1xf32> to vector<16x8x32xf32>
    %37 = arith.mulf %36, %35 : vector<16x8x32xf32>
    %cst_17 = arith.constant dense<0.000000e+00> : vector<16x32xf32>
    %38 = vector.multi_reduction <add>, %37, %cst_17 [1] : vector<16x8x32xf32> to vector<16x32xf32>
    %39 = vector.extract_strided_slice %31 {offsets = [0, 0, 0, 1], sizes = [16, 1, 8, 1], strides = [1, 1, 1, 1]} : vector<16x2x8x2xf32> to vector<16x1x8x1xf32>
    %40 = vector.shape_cast %39 : vector<16x1x8x1xf32> to vector<16x8x1xf32>
    %41 = vector.extract_strided_slice %30 {offsets = [0, 0, 0, 0], sizes = [16, 1, 8, 32], strides = [1, 1, 1, 1]} : vector<16x2x8x32xf32> to vector<16x1x8x32xf32>
    %42 = vector.shape_cast %41 : vector<16x1x8x32xf32> to vector<16x8x32xf32>
    %43 = vector.broadcast %40 : vector<16x8x1xf32> to vector<16x8x32xf32>
    %44 = arith.mulf %43, %42 : vector<16x8x32xf32>
    %cst_18 = arith.constant dense<0.000000e+00> : vector<16x32xf32>
    %45 = vector.multi_reduction <add>, %44, %cst_18 [1] : vector<16x8x32xf32> to vector<16x32xf32>
    %46 = vector.extract_strided_slice %31 {offsets = [0, 1, 0, 0], sizes = [16, 1, 8, 1], strides = [1, 1, 1, 1]} : vector<16x2x8x2xf32> to vector<16x1x8x1xf32>
    %47 = vector.shape_cast %46 : vector<16x1x8x1xf32> to vector<16x8x1xf32>
    %48 = vector.extract_strided_slice %30 {offsets = [0, 1, 0, 0], sizes = [16, 1, 8, 32], strides = [1, 1, 1, 1]} : vector<16x2x8x32xf32> to vector<16x1x8x32xf32>
    %49 = vector.shape_cast %48 : vector<16x1x8x32xf32> to vector<16x8x32xf32>
    %50 = vector.broadcast %47 : vector<16x8x1xf32> to vector<16x8x32xf32>
    %51 = arith.mulf %50, %49 : vector<16x8x32xf32>
    %cst_19 = arith.constant dense<0.000000e+00> : vector<16x32xf32>
    %52 = vector.multi_reduction <add>, %51, %cst_19 [1] : vector<16x8x32xf32> to vector<16x32xf32>
    %53 = vector.extract_strided_slice %31 {offsets = [0, 1, 0, 1], sizes = [16, 1, 8, 1], strides = [1, 1, 1, 1]} : vector<16x2x8x2xf32> to vector<16x1x8x1xf32>
    %54 = vector.shape_cast %53 : vector<16x1x8x1xf32> to vector<16x8x1xf32>
    %55 = vector.extract_strided_slice %30 {offsets = [0, 1, 0, 0], sizes = [16, 1, 8, 32], strides = [1, 1, 1, 1]} : vector<16x2x8x32xf32> to vector<16x1x8x32xf32>
    %56 = vector.shape_cast %55 : vector<16x1x8x32xf32> to vector<16x8x32xf32>
    %57 = vector.broadcast %54 : vector<16x8x1xf32> to vector<16x8x32xf32>
    %58 = arith.mulf %57, %56 : vector<16x8x32xf32>
    %cst_20 = arith.constant dense<0.000000e+00> : vector<16x32xf32>
    %59 = vector.multi_reduction <add>, %58, %cst_20 [1] : vector<16x8x32xf32> to vector<16x32xf32>
    %60 = tpu.concatenate %38, %45, %52, %59 in 1 : vector<16x32xf32>, vector<16x32xf32>, vector<16x32xf32>, vector<16x32xf32> -> vector<16x128xf32>
    %c0_21 = arith.constant 0 : index
    %c0_22 = arith.constant 0 : index
    %61 = vector.load %arg7[%c0_21, %c0_22] : memref<16x128xf32, #tpu.memory_space<vmem>>, vector<16x128xf32>
    tpu.vector_store %arg7[%c0_21, %c0_22], %60 {strides = array<i32>} : memref<16x128xf32, #tpu.memory_space<vmem>>, vector<16x128xf32>,
    return
  }
  func.func @transform_0(%arg0: i32) -> (i32, i32, i32) {
    %c0_i32 = arith.constant 0 : i32
    %c0_i32_0 = arith.constant 0 : i32
    %c0_i32_1 = arith.constant 0 : i32
    return %arg0, %c0_i32, %c0_i32_0 : i32, i32, i32
  }
  func.func @transform_1(%arg0: i32) -> (i32, i32) {
    %c0_i32 = arith.constant 0 : i32
    %c0_i32_0 = arith.constant 0 : i32
    return %arg0, %c0_i32 : i32, i32
  }
  func.func @transform_2(%arg0: i32) -> (i32, i32) {
    %c0_i32 = arith.constant 0 : i32
    %c0_i32_0 = arith.constant 0 : i32
    %c0_i32_1 = arith.constant 0 : i32
    return %c0_i32, %c0_i32_0 : i32, i32
  }
  func.func @transform_3(%arg0: i32) -> (i32, i32) {
    %c0_i32 = arith.constant 0 : i32
    %c0_i32_0 = arith.constant 0 : i32
    %c0_i32_1 = arith.constant 0 : i32
    return %c0_i32, %c0_i32_0 : i32, i32
  }
  func.func @transform_4(%arg0: i32) -> (i32, i32) {
    %c0_i32 = arith.constant 0 : i32
    %c0_i32_0 = arith.constant 0 : i32
    %c0_i32_1 = arith.constant 0 : i32
    return %c0_i32, %c0_i32_0 : i32, i32
  }
  func.func @transform_5(%arg0: i32) -> (i32, i32) {
    %c0_i32 = arith.constant 0 : i32
    %c0_i32_0 = arith.constant 0 : i32
    %c0_i32_1 = arith.constant 0 : i32
    return %c0_i32, %c0_i32_0 : i32, i32
  }
  func.func @transform_6(%arg0: i32) -> (i32, i32) {
    %c0_i32 = arith.constant 0 : i32
    %c0_i32_0 = arith.constant 0 : i32
    return %arg0, %c0_i32 : i32, i32
  }
}

</mosaic_0001>

<bundles_post_ra>
// kernel: tpu_custom_call.1
= control target key start
LH: loop header
LB: loop body
LE: loop exit
PB: predicated region body
PF: predicated region fallthrough
CT: control target
= control target key end

     0   :  { %11 = vsyncpa [#allocation3], 0  ;;  %s4857_s0 = inlined_call_operand.vmem [shape: f32[48,8,32], index: 0, kind: input, shape index: {}]   ;;  %s4858_s1 = inlined_call_operand.vmem [shape: f32[48,8], index: 1, kind: input, shape index: {}]   ;;  %s4859_s2 = inlined_call_operand.vmem [shape: f32[32,64], index: 2, kind: input, shape index: {}]   ;;  %s4860_s3 = inlined_call_operand.vmem [shape: f32[1,64], index: 3, kind: input, shape index: {}]   ;;  %s4861_s4 = inlined_call_operand.vmem [shape: f32[64,2], index: 4, kind: input, shape index: {}]   ;;  %s4862_s5 = inlined_call_operand.vmem [shape: f32[1,2], index: 5, kind: input, shape index: {}]   ;;  %s4863_s6 = inlined_call_operand.hbm [shape: f32[32,128], index: 6, kind: output, shape index: {}]  }
   0x1   :  { %13 = vsyncpa [#allocation3 + $0x1], 0  ;;  %s3646_s21 = smov 0   ;;  %s3648_s22 = smov 0  }
   0x2   :  { %s3650_s23 = smov 0   ;;  %s3652_s24 = smov 0  }
   0x3 LB: > { %s3667_s25 = sadd.s32 4294967295, %s3601_s24   ;;  %s2994_s26 = sadd.s32 4294967294, %s3601_s24   ;;  %s3601_s24 = sphi %s3652_s24, %s4881_s24   ;;  %s3597_s23 = sphi %s3650_s23, %s4880_s23   ;;  %s3593_s22 = sphi %s3648_s22, %s4879_s22   ;;  %s3589_s21 = sphi %s3646_s21, %s4878_s21  }
   0x4   : > { %s3671_s27 = sadd.s32 1, %s3601_s24   ;;  %s162_s28 = sadd.s32 1, %s3597_s23 }
   0x5   : > { %s159_s29 = ssub.s32 %s3601_s24, %s3671_s27  ;;  %p172_p0 = scmp.ne.s32.totalorder %s3597_s23, %s3593_s22 }
   0x6   : > { %p160_p1 = scmp.eq.s32.totalorder %s159_s29, 0  ;;  %p173_p2 = scmp.eq.s32.totalorder %s3667_s25, 1 }
   0x7   : > { %p178_p3 = scmp.ne.s32.totalorder %s3593_s22, %s3589_s21  ;;  %p179_p4 = scmp.eq.s32.totalorder %s2994_s26, 1 }
   0x8   : > { %s3682_s30 = scalar_select %p160_p1, %s3597_s23, %s162_s28  }
   0x9   : > { %p3684_p5 = por %p173_p2, %p172_p0  ;;  %p3688_p6 = por %p179_p4, %p178_p3 }
   0xa   : > { %p2997_p7 = scmp.ge.s32.totalorder %s3601_s24, 1  ;;  %p243_p8 = scmp.lt.s32.totalorder %s3601_s24, 3 }
   0xc   : > { %p244_p9 = pnand %p2997_p7, %p243_p8 }
   0xd   : > { %s2999_s13 = sshll.u32 (!%p244_p9), %s3667_s25, 5  ;;  %s3001_s29 = sshll.u32 (!%p244_p9), %s3667_s25, 2 }
   0xe   : > { %247 = sbr.rel (%p244_p9) target bundleno = 953 (0x3b9), region = 44  ;;  %p291_p10 = scmp.lt.s32.totalorder (!%p244_p9), %s2999_s13, 47 }
   0xf   : > { %p305_p11 = scmp.lt.s32.totalorder (!%p244_p9), %s3001_s29, 5  ;;  %s3605_s20 = smov (!%p244_p9), 64  }
  0x10   : > { %s3606_s26 = smov (!%p244_p9), 32   ;;  %s3074_s11 = sshll.u32 (!%p244_p9), %s3667_s25, 8 }
  0x11   : > { %s4815_s15 = scalar_lea.hbm (!%p244_p9), %s4863_s6, %s3074_s11  ;;  %s3608_s25 = smov (!%p244_p9), [#allocation2]  }
  0x12   : > { %s3545_s18 = sshll.u32 (!%p244_p9), %s3608_s25, 4  ;;  %s3546_s18 = int_to_ptr.vmem [resolvable:$false] %s3545_s18 }
  0x13   : > { %v350_v0 = vld [vmem:[%s4859_s2 + $0x18] sm:$0xff]  ;;  %v349_v1 = vld [vmem:[%s4859_s2 + $0x10] sm:$0xff]  ;;  %v348_v3 = vld [vmem:[%s4859_s2 + $0x8] sm:$0xff]  ;;  %s4883_s13 = smov (!%p291_p10, %s2999_s13), 47  ;;  %vm358_vm0 = vcmask 261120   ;;  %v1053_v44 = vlaneseq  ;;  %s4885_s29 = smov (!%p305_p11, %s3001_s29), 5 }
  0x14   : > { %3151 = vmatprep.subr.mxu0 %v350_v0  ;;  %v719_v2 = vld [vmem:[%s4861_s4 + $0x38] sm:$0xff]  ;;  %v718_v4 = vld [vmem:[%s4861_s4 + $0x30] sm:$0xff]  ;;  %v347_v5 = vld [vmem:[%s4859_s2] sm:$0xff]  ;;  %s3000_s28 = sshll.u32 %s4883_s13, 3  ;;  %s3002_s9 = sshll.u32 %s4885_s29, 3  ;;  %vm727_vm1 = vcmask 523264  }
  0x15   : > { %3152 = vmatpush3.msra.mxu0 %v350_v0  ;;  %3271 = vmatprep.subr.mxu1 %v719_v2  ;;  %v717_v6 = vld [vmem:[%s4861_s4 + $0x28] sm:$0xff]  ;;  %s3719_s12 = scalar_lea.vmem %s4857_s0, %s3000_s28  ;;  %v716_v11 = vld [vmem:[%s4861_s4 + $0x20] sm:$0xff]  ;;  %v715_v14 = vld [vmem:[%s4861_s4 + $0x18] sm:$0xff]  ;;  %v1054_v45 = vshrl.u32 %v1053_v44, 7  ;;  %s3808_s13 = scalar_lea.vmem %s4858_s1, %s3002_s9  ;;  %vm1309_vm2 = vcmask 15360   ;;  %vm2766_vm3 = vcmask 1041409  }
  0x16   : > { %3153 = vmatprep.subr.mxu0 %v349_v1  ;;  %3279 = vmatpush3.msra.mxu1 %v719_v2  ;;  %v315_v7 = vld [vmem:[%s3719_s12] sm:$0xff]  ;;  %v316_v8 = vld [vmem:[%s3719_s12 + $0x8] sm:$0xff]  ;;  %v317_v9 = vld [vmem:[%s3719_s12 + $0x10] sm:$0xff]  ;;  %vm2768_vm4 = vcmask 1042434   ;;  %vm2770_vm5 = vcmask 1043459   ;;  %vm2772_vm6 = vcmask 1044484  }
  0x17   : > { %3154 = vmatpush3.msra.mxu0 %v349_v1  ;;  %3272 = vmatprep.subr.mxu1 %v718_v4  ;;  %v318_v10 = vld [vmem:[%s3719_s12 + $0x18] sm:$0xff]  ;;  %v319_v12 = vld [vmem:[%s3719_s12 + $0x20] sm:$0xff]  ;;  %v320_v13 = vld [vmem:[%s3719_s12 + $0x28] sm:$0xff]  ;;  %v3801_v46 = vsub.s32 0, %v1054_v45  ;;  %v3803_v47 = vsub.s32 2, %v1054_v45  ;;  %v1062_v48 = vsub.s32 1, %v1054_v45 }
  0x18   : > { %3155 = vmatprep.subr.mxu0 %v348_v3  ;;  %3280 = vmatpush3.msra.mxu1 %v718_v4  ;;  %v321_v15 = vld [vmem:[%s3719_s12 + $0x30] sm:$0xff]  ;;  %v322_v17 = vld [vmem:[%s3719_s12 + $0x38] sm:$0xff]  ;;  %v713_v18 = vld [vmem:[%s4861_s4 + $0x8] sm:$0xff]  ;;  %v3810_v49 = vsub.s32 3, %v1054_v45  ;;  %v1090_v55 = vsub.s32 5, %v1054_v45  ;;  %v1083_v56 = vsub.s32 4, %v1054_v45 }
  0x19   : > { %3156 = vmatpush3.msra.mxu0 %v348_v3  ;;  %3273 = vmatprep.subr.mxu1 %v717_v6  ;;  %v714_v16 = vld [vmem:[%s4861_s4 + $0x10] sm:$0xff]  ;;  %v323_v19 = vld [vmem:[%s3719_s12 + $0x40] sm:$0xff]  ;;  %v324_v21 = vld [vmem:[%s3719_s12 + $0x48] sm:$0xff]  ;;  %v3816_v59 = vsub.s32 7, %v1054_v45  ;;  %v3818_v60 = vsub.s32 6, %v1054_v45  ;;  %vm2774_vm7 = vcmask 1045509  }
  0x1a   : > { %3157 = vmatprep.subr.mxu0 %v347_v5  ;;  %3281 = vmatpush3.msra.mxu1 %v717_v6  ;;  %v712_v20 = vld [vmem:[%s4861_s4] sm:$0xff]  ;;  %v325_v22 = vld [vmem:[%s3719_s12 + $0x50] sm:$0xff]  ;;  %v326_v23 = vld [vmem:[%s3719_s12 + $0x58] sm:$0xff]  ;;  %vm2776_vm8 = vcmask 1046534   ;;  %vm2778_vm9 = vcmask 1047559   ;;  %s283_s28 = sand.u32 1, %s3593_s22  }
  0x1b   : > { %3158 = vmatpush3.msra.mxu0 %v347_v5  ;;  %3159 = vmatprep.mubr.msk.f32.mxu0 %vm358_vm0, %v315_v7  ;;  %v327_v24 = vld [vmem:[%s3719_s12 + $0x60] sm:$0xff]  ;;  %v328_v25 = vld [vmem:[%s3719_s12 + $0x68] sm:$0xff]  ;;  %v329_v26 = vld [vmem:[%s3719_s12 + $0x70] sm:$0xff]  ;;  %s2998_s29 = sshll.u32 %s283_s28, 4  ;;  %vm2901_vm10 = vcmask 785408   ;;  %s4817_s16 = scalar_lea.sflag [#allocation3], %s283_s28 }
  0x1c   : > { %3160 = vmatmul.mubr.msk.f32.vlgmr.msra.gmra.mxu0 %vm358_vm0, %v316_v8  ;;  %3207 = vmatprep.subr.mxu0 %v719_v2  ;;  %v330_v27 = vld [vmem:[%s3719_s12 + $0x78] sm:$0xff]  ;;  %v331_v28 = vld [vmem:[%s3719_s12 + $0x80] sm:$0xff]  ;;  %v332_v29 = vld [vmem:[%s3719_s12 + $0x88] sm:$0xff]  ;;  %s285_s9 = scalar_lea.vmem [#allocation2], %s2998_s29  ;;  %s3547_s19 = scalar_lea.vmem %s3546_s18, 512 }
  0x1d   : > { %3162 = vmatprep.mubr.msk.f32.mxu0 %vm358_vm0, %v317_v9  ;;  %3208 = vmatpush3.msra.mxu0 %v719_v2  ;;  %v333_v30 = vld [vmem:[%s3719_s12 + $0x90] sm:$0xff]  ;;  %v334_v31 = vld [vmem:[%s3719_s12 + $0x98] sm:$0xff]  ;;  %v335_v32 = vld [vmem:[%s3719_s12 + $0xa0] sm:$0xff]  ;;  %s2920_s10 = sshll.u32 %s285_s9, 4  ;;  %s4809_s10 = int_to_ptr.vmem [resolvable:$true] %s2920_s10 }
  0x1e   : > { %3209 = vmatprep.subr.mxu0 %v718_v4  ;;  %3274 = vmatprep.subr.mxu1 %v716_v11  ;;  %v336_v33 = vld [vmem:[%s3719_s12 + $0xa8] sm:$0xff]  ;;  %v337_v34 = vld [vmem:[%s3719_s12 + $0xb0] sm:$0xff]  ;;  %v338_v35 = vld [vmem:[%s3719_s12 + $0xb8] sm:$0xff]  ;;  %s3541_s17 = scalar_lea.vmem %s4809_s10, 256  ;;  %p3548_p1 = scmp.lt.s32.totalorder %s4809_s10, %s3546_s18 }
  0x1f   : > { %3210 = vmatpush3.msra.mxu0 %v718_v4  ;;  %3282 = vmatpush3.msra.mxu1 %v716_v11  ;;  %v339_v36 = vld [vmem:[%s3719_s12 + $0xc0] sm:$0xff]  ;;  %v340_v37 = vld [vmem:[%s3719_s12 + $0xc8] sm:$0xff]  ;;  %v341_v38 = vld [vmem:[%s3719_s12 + $0xd0] sm:$0xff]  ;;  %p3542_p12 = scmp.ne.s32.totalorder %s4809_s10, %s3541_s17  ;;  %p3549_p2 = scmp.lt.s32.totalorder %s3547_s19, %s3541_s17 }
  0x20   : > { %3163 = vmatmul.mubr.msk.f32.gmra.mxu0 %vm358_vm0, %v318_v10  ;;  %3211 = vmatprep.subr.mxu0 %v717_v6  ;;  %v342_v39 = vld [vmem:[%s3719_s12 + $0xd8] sm:$0xff]  ;;  %v343_v40 = vld [vmem:[%s3719_s12 + $0xe0] sm:$0xff]  ;;  %v344_v41 = vld [vmem:[%s3719_s12 + $0xe8] sm:$0xff] }
  0x21   : > { %3165 = vmatprep.mubr.msk.f32.mxu0 %vm358_vm0, %v319_v12  ;;  %3212 = vmatpush3.msra.mxu0 %v717_v6  ;;  %v345_v42 = vld [vmem:[%s3719_s12 + $0xf0] sm:$0xff]  ;;  %v346_v43 = vld [vmem:[%s3719_s12 + $0xf8] sm:$0xff]  ;;  %v1049_v50 = vld [vmem:[%s3808_s13] sm:$0xff]  ;;  %p3543_p13 = pnand %p3542_p12, %p3684_p5  ;;  %p3550_p3 = por %p3549_p2, %p3548_p1 }
  0x22   : > { %3213 = vmatprep.subr.mxu0 %v716_v11  ;;  %3275 = vmatprep.subr.mxu1 %v715_v14  ;;  %v1056_v51 = vrot.slane %v1049_v50, %v3801_v46  ;;  %v1070_v52 = vrot.slane %v1049_v50, %v3803_v47  ;;  %v1063_v53 = vrot.slane %v1049_v50, %v1062_v48  ;;  %v1050_v63 = vld [vmem:[%s3808_s13 + $0x8] sm:$0xff]  ;;  %v1051_v8 = vld [vmem:[%s3808_s13 + $0x10] sm:$0xff] }
  0x23   : > { %3214 = vmatpush3.msra.mxu0 %v716_v11  ;;  %3283 = vmatpush3.msra.mxu1 %v715_v14  ;;  %v1077_v54 = vrot.slane %v1049_v50, %v3810_v49  ;;  %v1091_v57 = vrot.slane %v1049_v50, %v1090_v55  ;;  %v1084_v58 = vrot.slane %v1049_v50, %v1083_v56  ;;  %p3544_p0 = pneg %p3543_p13 }
  0x24   : > { %3166 = vmatmul.mubr.msk.f32.gmra.mxu0 %vm358_vm0, %v320_v13  ;;  %3215 = vmatprep.subr.mxu0 %v715_v14  ;;  %v1105_v61 = vrot.slane %v1049_v50, %v3816_v59  ;;  %v1098_v62 = vrot.slane %v1049_v50, %v3818_v60  ;;  %v1119_v0 = vrot.slane %v1050_v63, %v1062_v48 }
  0x25   : > { %3168 = vmatprep.mubr.msk.f32.mxu0 %vm358_vm0, %v321_v15  ;;  %3216 = vmatpush3.msra.mxu0 %v715_v14  ;;  %v1112_v1 = vrot.slane %v1050_v63, %v3801_v46  ;;  %v1133_v2 = vrot.slane %v1050_v63, %v3810_v49  ;;  %v1126_v3 = vrot.slane %v1050_v63, %v3803_v47  ;;  %p3551_p4 = pnand %p3550_p3, %p3544_p0 }
  0x26   : > { %3217 = vmatprep.subr.mxu0 %v714_v16  ;;  %3276 = vmatprep.subr.mxu1 %v714_v16  ;;  %v1147_v4 = vrot.slane %v1050_v63, %v1090_v55  ;;  %v1140_v5 = vrot.slane %v1050_v63, %v1083_v56  ;;  %v1161_v6 = vrot.slane %v1050_v63, %v3816_v59 }
  0x27   : > { %3218 = vmatpush3.msra.mxu0 %v714_v16  ;;  %3284 = vmatpush3.msra.mxu1 %v714_v16  ;;  %v1154_v7 = vrot.slane %v1050_v63, %v3818_v60  ;;  %v1175_v9 = vrot.slane %v1051_v8, %v1062_v48  ;;  %v1168_v10 = vrot.slane %v1051_v8, %v3801_v46 }
  0x28   : > { %3169 = vmatmul.mubr.msk.f32.gmra.mxu0 %vm358_vm0, %v322_v17  ;;  %3219 = vmatprep.subr.mxu0 %v713_v18  ;;  %v1189_v11 = vrot.slane %v1051_v8, %v3810_v49  ;;  %v1182_v12 = vrot.slane %v1051_v8, %v3803_v47  ;;  %v1203_v13 = vrot.slane %v1051_v8, %v1090_v55  ;;  %v3835_v17 = vld [vmem:[%s3808_s13 + $0x18] sm:$0xff] }
  0x29   : > { %3171 = vmatprep.mubr.msk.f32.mxu0 %vm358_vm0, %v323_v19  ;;  %3220 = vmatpush3.msra.mxu0 %v713_v18  ;;  %v1196_v14 = vrot.slane %v1051_v8, %v1083_v56  ;;  %v1217_v15 = vrot.slane %v1051_v8, %v3816_v59  ;;  %v1210_v16 = vrot.slane %v1051_v8, %v3818_v60 }
  0x2a   : > { %3221 = vmatprep.subr.mxu0 %v712_v20  ;;  %3277 = vmatprep.subr.mxu1 %v713_v18  ;;  %v1224_v19 = vrot.slane %v3835_v17, %v3801_v46 }
  0x2b   : > { %3222 = vmatpush3.msra.mxu0 %v712_v20  ;;  %3285 = vmatpush3.msra.mxu1 %v713_v18  ;;  %v1231_v18 = vrot.slane %v3835_v17, %v1062_v48 }
  0x2c   : > { %3172 = vmatmul.mubr.msk.f32.gmra.mxu0 %vm358_vm0, %v324_v21  ;;  %3278 = vmatprep.subr.mxu1 %v712_v20  ;;  %v1238_v21 = vrot.slane %v3835_v17, %v3803_v47 }
  0x2d   : > { %3174 = vmatprep.mubr.msk.f32.mxu0 %vm358_vm0, %v325_v22  ;;  %3286 = vmatpush3.msra.mxu1 %v712_v20  ;;  %v1245_v20 = vrot.slane %v3835_v17, %v3810_v49  ;;  %v1252_v22 = vrot.slane %v3835_v17, %v1083_v56 }
  0x2e   : > { %1058 = vbcast.lane.b32.xlu0 %v1056_v51, 256  ;;  %1072 = vbcast.lane.b32.xlu1 %v1070_v52, 256 }
  0x30   : > { %3175 = vmatmul.mubr.msk.f32.gmra.mxu0 %vm358_vm0, %v326_v23  ;;  %v1259_v23 = vrot.slane %v3835_v17, %v1090_v55 }
  0x31   : > { %3177 = vmatprep.mubr.msk.f32.mxu0 %vm358_vm0, %v327_v24  ;;  %v3849_v24 = vld [vmem:[%s4860_s3] ss:$0 sm:$0xff] }
  0x32   : > { %1065 = vbcast.lane.b32.xlu0 %v1063_v53, 256  ;;  %1079 = vbcast.lane.b32.xlu1 %v1077_v54, 256 }
  0x34   : > { %3178 = vmatmul.mubr.msk.f32.gmra.mxu0 %vm358_vm0, %v328_v25 }
  0x35   : > { %3180 = vmatprep.mubr.msk.f32.mxu0 %vm358_vm0, %v329_v26 }
  0x36   : > { %1093 = vbcast.lane.b32.xlu1 %v1091_v57, 256  ;;  %1086 = vbcast.lane.b32.xlu0 %v1084_v58, 256 }
  0x38   : > { %3181 = vmatmul.mubr.msk.f32.gmra.mxu0 %vm358_vm0, %v330_v27 }
  0x39   : > { %3183 = vmatprep.mubr.msk.f32.mxu0 %vm358_vm0, %v331_v28 }
  0x3a   : > { %1107 = vbcast.lane.b32.xlu1 %v1105_v61, 256  ;;  %1100 = vbcast.lane.b32.xlu0 %v1098_v62, 256 }
  0x3c   : > { %3184 = vmatmul.mubr.msk.f32.gmra.mxu0 %vm358_vm0, %v332_v29 }
  0x3d   : > { %3186 = vmatprep.mubr.msk.f32.mxu0 %vm358_vm0, %v333_v30 }
  0x3e   : > { %1121 = vbcast.lane.b32.xlu1 %v1119_v0, 256  ;;  %1114 = vbcast.lane.b32.xlu0 %v1112_v1, 256 }
  0x40   : > { %3187 = vmatmul.mubr.msk.f32.gmra.mxu0 %vm358_vm0, %v334_v31 }
  0x41   : > { %3189 = vmatprep.mubr.msk.f32.mxu0 %vm358_vm0, %v335_v32 }
  0x42   : > { %1135 = vbcast.lane.b32.xlu1 %v1133_v2, 256  ;;  %1128 = vbcast.lane.b32.xlu0 %v1126_v3, 256 }
  0x44   : > { %3190 = vmatmul.mubr.msk.f32.gmra.mxu0 %vm358_vm0, %v336_v33 }
  0x45   : > { %3192 = vmatprep.mubr.msk.f32.mxu0 %vm358_vm0, %v337_v34 }
  0x46   : > { %1149 = vbcast.lane.b32.xlu1 %v1147_v4, 256  ;;  %1142 = vbcast.lane.b32.xlu0 %v1140_v5, 256 }
  0x48   : > { %3193 = vmatmul.mubr.msk.f32.gmra.mxu0 %vm358_vm0, %v338_v35 }
  0x49   : > { %3195 = vmatprep.mubr.msk.f32.mxu0 %vm358_vm0, %v339_v36 }
  0x4a   : > { %1163 = vbcast.lane.b32.xlu1 %v1161_v6, 256  ;;  %1156 = vbcast.lane.b32.xlu0 %v1154_v7, 256 }
  0x4c   : > { %3196 = vmatmul.mubr.msk.f32.gmra.mxu0 %vm358_vm0, %v340_v37 }
  0x4d   : > { %3198 = vmatprep.mubr.msk.f32.mxu0 %vm358_vm0, %v341_v38 }
  0x4e   : > { %1177 = vbcast.lane.b32.xlu1 %v1175_v9, 256  ;;  %1170 = vbcast.lane.b32.xlu0 %v1168_v10, 256 }
  0x50   : > { %3199 = vmatmul.mubr.msk.f32.gmra.mxu0 %vm358_vm0, %v342_v39 }
  0x51   : > { %3201 = vmatprep.mubr.msk.f32.mxu0 %vm358_vm0, %v343_v40 }
  0x52   : > { %1191 = vbcast.lane.b32.xlu1 %v1189_v11, 256  ;;  %1184 = vbcast.lane.b32.xlu0 %v1182_v12, 256 }
  0x54   : > { %3202 = vmatmul.mubr.msk.f32.gmra.mxu0 %vm358_vm0, %v344_v41 }
  0x55   : > { %3204 = vmatprep.mubr.msk.f32.mxu0 %vm358_vm0, %v345_v42 }
  0x56   : > { %1205 = vbcast.lane.b32.xlu1 %v1203_v13, 256  ;;  %1198 = vbcast.lane.b32.xlu0 %v1196_v14, 256 }
  0x58   : > { %3205 = vmatmul.mubr.msk.f32.gmra.mxu0 %vm358_vm0, %v346_v43 }
  0x5a   : > { %1219 = vbcast.lane.b32.xlu1 %v1217_v15, 256  ;;  %1212 = vbcast.lane.b32.xlu0 %v1210_v16, 256 }
  0x5e   : > { %1233 = vbcast.lane.b32.xlu1 %v1231_v18, 256  ;;  %1226 = vbcast.lane.b32.xlu0 %v1224_v19, 256 }
  0x62   : > { %1247 = vbcast.lane.b32.xlu1 %v1245_v20, 256  ;;  %1240 = vbcast.lane.b32.xlu0 %v1238_v21, 256 }
  0x66   : > { %1254 = vbcast.lane.b32.xlu0 %v1252_v22, 256  ;;  %1261 = vbcast.lane.b32.xlu1 %v1259_v23, 256 }
  0xdc   : > { %v3161_v25 = vpop.f32.mrf.mxu0 }
  0xdd   : > { %v527_v26 = vadd.f32 %v3161_v25, %v3849_v24 }
  0xde   : > { %v521_v27 = vpop.f32.mrf.mxu0 }
  0xdf   : > { %v522_v28 = vadd.f32 %v3849_v24, %v521_v27  ;;  %v681_v32 = vmax.f32 %v527_v26, 0.0 }
  0xe0   : > { %v3164_v29 = vpop.f32.mrf.mxu0 }
  0xe1   : > { %v680_v30 = vmax.f32 %v522_v28, 0.0  ;;  %v537_v31 = vadd.f32 %v3164_v29, %v3849_v24 }
  0xe2   : > { %v531_v33 = vpop.f32.mrf.mxu0 }
  0xe3   : > { %v532_v34 = vadd.f32 %v3849_v24, %v531_v33  ;;  %3223 = vmatprep.mubr.msk.f32.mxu0 %vm727_vm1, %v680_v30  ;;  %v683_v35 = vmax.f32 %v537_v31, 0.0 }
  0xe4   : > { %v3167_v36 = vpop.f32.mrf.mxu0  ;;  %3224 = vmatmul.mubr.msk.f32.vlgmr.msra.gmra.mxu0 %vm727_vm1, %v681_v32 }
  0xe5   : > { %v682_v37 = vmax.f32 %v532_v34, 0.0  ;;  %v547_v38 = vadd.f32 %v3167_v36, %v3849_v24 }
  0xe6   : > { %v541_v39 = vpop.f32.mrf.mxu0 }
  0xe7   : > { %v542_v40 = vadd.f32 %v3849_v24, %v541_v39  ;;  %3226 = vmatprep.mubr.msk.f32.mxu1 %vm727_vm1, %v682_v37  ;;  %v685_v41 = vmax.f32 %v547_v38, 0.0 }
  0xe8   : > { %v3170_v42 = vpop.f32.mrf.mxu0  ;;  %3227 = vmatmul.mubr.msk.f32.vlgmr.msra.gmra.mxu1 %vm727_vm1, %v683_v35 }
  0xe9   : > { %v684_v43 = vmax.f32 %v542_v40, 0.0  ;;  %v557_v44 = vadd.f32 %v3170_v42, %v3849_v24 }
  0xea   : > { %v551_v45 = vpop.f32.mrf.mxu0 }
  0xeb   : > { %v552_v46 = vadd.f32 %v3849_v24, %v551_v45  ;;  %3229 = vmatprep.mubr.msk.f32.mxu1 %vm727_vm1, %v684_v43  ;;  %v687_v47 = vmax.f32 %v557_v44, 0.0 }
  0xec   : > { %v3173_v48 = vpop.f32.mrf.mxu0  ;;  %3230 = vmatmul.mubr.msk.f32.gmra.mxu1 %vm727_vm1, %v685_v41 }
  0xed   : > { %v686_v49 = vmax.f32 %v552_v46, 0.0  ;;  %v567_v50 = vadd.f32 %v3173_v48, %v3849_v24 }
  0xee   : > { %v561_v51 = vpop.f32.mrf.mxu0 }
  0xef   : > { %v562_v52 = vadd.f32 %v3849_v24, %v561_v51  ;;  %3232 = vmatprep.mubr.msk.f32.mxu1 %vm727_vm1, %v686_v49  ;;  %v689_v53 = vmax.f32 %v567_v50, 0.0 }
  0xf0   : > { %v3176_v54 = vpop.f32.mrf.mxu0  ;;  %3233 = vmatmul.mubr.msk.f32.gmra.mxu1 %vm727_vm1, %v687_v47 }
  0xf1   : > { %v688_v55 = vmax.f32 %v562_v52, 0.0  ;;  %v577_v56 = vadd.f32 %v3176_v54, %v3849_v24 }
  0xf2   : > { %v571_v57 = vpop.f32.mrf.mxu0 }
  0xf3   : > { %v572_v58 = vadd.f32 %v3849_v24, %v571_v57  ;;  %3235 = vmatprep.mubr.msk.f32.mxu1 %vm727_vm1, %v688_v55  ;;  %v691_v61 = vmax.f32 %v577_v56, 0.0 }
  0xf4   : > { %v3179_v62 = vpop.f32.mrf.mxu0  ;;  %3236 = vmatmul.mubr.msk.f32.gmra.mxu1 %vm727_vm1, %v689_v53 }
  0xf5   : > { %v690_v63 = vmax.f32 %v572_v58, 0.0  ;;  %v587_v0 = vadd.f32 %v3179_v62, %v3849_v24 }
  0xf6   : > { %v581_v1 = vpop.f32.mrf.mxu0 }
  0xf7   : > { %v582_v2 = vadd.f32 %v3849_v24, %v581_v1  ;;  %3238 = vmatprep.mubr.msk.f32.mxu1 %vm727_vm1, %v690_v63  ;;  %v693_v3 = vmax.f32 %v587_v0, 0.0  ;;  %v1266_v63 = vrot.slane %v3835_v17, %v3818_v60  ;;  %v1273_v0 = vrot.slane %v3835_v17, %v3816_v59 }
  0xf8   : > { %3239 = vmatmul.mubr.msk.f32.gmra.mxu1 %vm727_vm1, %v691_v61  ;;  %v3182_v4 = vpop.f32.mrf.mxu0  ;;  %v4864_v1 = vmov 1  }
  0xf9   : > { %v692_v5 = vmax.f32 %v582_v2, 0.0  ;;  %v597_v6 = vadd.f32 %v3182_v4, %v3849_v24  ;;  %1268 = vbcast.lane.b32.xlu0 %v1266_v63, 256  ;;  %1275 = vbcast.lane.b32.xlu1 %v1273_v0, 256  ;;  %v1059_v2 = vpop.permute.xlu0 %1058  ;;  %v3924_v4 = vld [vmem:[%s4862_s5] ss:$0 sm:$0xff] }
  0xfa   : > { %v591_v7 = vpop.f32.mrf.mxu0  ;;  %3334 = vset.pattern.permute.xlu0 %v4864_v1 }
  0xfb   : > { %3241 = vmatprep.mubr.msk.f32.mxu1 %vm727_vm1, %v692_v5  ;;  %v592_v8 = vadd.f32 %v3849_v24, %v591_v7  ;;  %v695_v9 = vmax.f32 %v597_v6, 0.0 }
  0xfc   : > { %3242 = vmatmul.mubr.msk.f32.gmra.mxu1 %vm727_vm1, %v693_v3  ;;  %v3185_v10 = vpop.f32.mrf.mxu0  ;;  %v1073_v3 = vpop.permute.xlu1 %1072 }
  0xfd   : > { %v694_v11 = vmax.f32 %v592_v8, 0.0  ;;  %v607_v12 = vadd.f32 %v3185_v10, %v3849_v24  ;;  %v1066_v5 = vpop.permute.xlu0 %1065 }
  0xfe   : > { %v601_v13 = vpop.f32.mrf.mxu0 }
  0xff   : > { %3244 = vmatprep.mubr.msk.f32.mxu1 %vm727_vm1, %v694_v11  ;;  %v602_v14 = vadd.f32 %v3849_v24, %v601_v13  ;;  %v697_v15 = vmax.f32 %v607_v12, 0.0 }
 0x100   : > { %3245 = vmatmul.mubr.msk.f32.gmra.mxu1 %vm727_vm1, %v695_v9  ;;  %v3188_v16 = vpop.f32.mrf.mxu0  ;;  %v1080_v6 = vpop.permute.xlu1 %1079 }
 0x101   : > { %v696_v18 = vmax.f32 %v602_v14, 0.0  ;;  %v617_v19 = vadd.f32 %v3188_v16, %v3849_v24 }
 0x102   : > { %v611_v20 = vpop.f32.mrf.mxu0 }
 0x103   : > { %3247 = vmatprep.mubr.msk.f32.mxu1 %vm727_vm1, %v696_v18  ;;  %v612_v21 = vadd.f32 %v3849_v24, %v611_v20  ;;  %v699_v22 = vmax.f32 %v617_v19, 0.0 }
 0x104   : > { %3248 = vmatmul.mubr.msk.f32.gmra.mxu1 %vm727_vm1, %v697_v15  ;;  %v3191_v23 = vpop.f32.mrf.mxu0  ;;  %v1094_v15 = vpop.permute.xlu1 %1093 }
 0x105   : > { %v698_v25 = vmax.f32 %v612_v21, 0.0  ;;  %v627_v26 = vadd.f32 %v3191_v23, %v3849_v24  ;;  %v1087_v23 = vpop.permute.xlu0 %1086 }
 0x106   : > { %v621_v27 = vpop.f32.mrf.mxu0 }
 0x107   : > { %3250 = vmatprep.mubr.msk.f32.mxu1 %vm727_vm1, %v698_v25  ;;  %v622_v28 = vadd.f32 %v3849_v24, %v621_v27  ;;  %v701_v29 = vmax.f32 %v627_v26, 0.0 }
 0x108   : > { %3251 = vmatmul.mubr.msk.f32.gmra.mxu1 %vm727_vm1, %v699_v22  ;;  %v3194_v30 = vpop.f32.mrf.mxu0 }
 0x109   : > { %v700_v31 = vmax.f32 %v622_v28, 0.0  ;;  %v637_v32 = vadd.f32 %v3194_v30, %v3849_v24 }
 0x10a   : > { %v631_v33 = vpop.f32.mrf.mxu0 }
 0x10b   : > { %3253 = vmatprep.mubr.msk.f32.mxu1 %vm727_vm1, %v700_v31  ;;  %v632_v34 = vadd.f32 %v3849_v24, %v631_v33  ;;  %v703_v35 = vmax.f32 %v637_v32, 0.0 }
 0x10c   : > { %3254 = vmatmul.mubr.msk.f32.gmra.mxu1 %vm727_vm1, %v701_v29  ;;  %v3197_v36 = vpop.f32.mrf.mxu0 }
 0x10d   : > { %v702_v37 = vmax.f32 %v632_v34, 0.0  ;;  %v647_v38 = vadd.f32 %v3197_v36, %v3849_v24 }
 0x10e   : > { %v641_v39 = vpop.f32.mrf.mxu0 }
 0x10f   : > { %3256 = vmatprep.mubr.msk.f32.mxu1 %vm727_vm1, %v702_v37  ;;  %v642_v40 = vadd.f32 %v3849_v24, %v641_v39  ;;  %v705_v41 = vmax.f32 %v647_v38, 0.0  ;;  %v1108_v37 = vpop.permute.xlu1 %1107 }
 0x110   : > { %3257 = vmatmul.mubr.msk.f32.gmra.mxu1 %vm727_vm1, %v703_v35  ;;  %v3200_v42 = vpop.f32.mrf.mxu0 }
 0x111   : > { %v704_v43 = vmax.f32 %v642_v40, 0.0  ;;  %v657_v44 = vadd.f32 %v3200_v42, %v3849_v24 }
 0x112   : > { %v651_v45 = vpop.f32.mrf.mxu0 }
 0x113   : > { %3259 = vmatprep.mubr.msk.f32.mxu1 %vm727_vm1, %v704_v43  ;;  %v652_v46 = vadd.f32 %v3849_v24, %v651_v45  ;;  %v707_v47 = vmax.f32 %v657_v44, 0.0  ;;  %v1101_v45 = vpop.permute.xlu0 %1100 }
 0x114   : > { %3260 = vmatmul.mubr.msk.f32.gmra.mxu1 %vm727_vm1, %v705_v41  ;;  %v3203_v48 = vpop.f32.mrf.mxu0 }
 0x115   : > { %v706_v49 = vmax.f32 %v652_v46, 0.0  ;;  %v667_v50 = vadd.f32 %v3203_v48, %v3849_v24 }
 0x116   : > { %v661_v51 = vpop.f32.mrf.mxu0 }
 0x117   : > { %3262 = vmatprep.mubr.msk.f32.mxu1 %vm727_vm1, %v706_v49  ;;  %v662_v52 = vadd.f32 %v3849_v24, %v661_v51  ;;  %v709_v53 = vmax.f32 %v667_v50, 0.0 }
 0x118   : > { %3263 = vmatmul.mubr.msk.f32.gmra.mxu1 %vm727_vm1, %v707_v47  ;;  %v3206_v54 = vpop.f32.mrf.mxu0 }
 0x119   : > { %v708_v55 = vmax.f32 %v662_v52, 0.0  ;;  %v677_v56 = vadd.f32 %v3206_v54, %v3849_v24 }
 0x11a   : > { %v671_v57 = vpop.f32.mrf.mxu0 }
 0x11b   : > { %v672_v58 = vadd.f32 %v3849_v24, %v671_v57  ;;  %3265 = vmatprep.mubr.msk.f32.mxu1 %vm727_vm1, %v708_v55  ;;  %v711_v61 = vmax.f32 %v677_v56, 0.0  ;;  %v4866_v24 = vmov 0  }
 0x11c   : > { %3266 = vmatmul.mubr.msk.f32.gmra.mxu1 %vm727_vm1, %v709_v53  ;;  %3333 = vset.pattern.permute.xlu1 %v4866_v24 }
 0x11d   : > { %v710_v62 = vmax.f32 %v672_v58, 0.0 }
 0x11f   : > { %3268 = vmatprep.mubr.msk.f32.mxu1 %vm727_vm1, %v710_v62 }
 0x120   : > { %3269 = vmatmul.mubr.msk.f32.gmra.mxu1 %vm727_vm1, %v711_v61 }
 0x1a4   : > { %v3225_v60 = vpop.f32.mrf.mxu0 }
 0x1a5   : > { %v896_v7 = vadd.f32 %v3225_v60, %v3924_v4 }
 0x1a6   : > { %v890_v59 = vpop.f32.mrf.mxu0 }
 0x1a7   : > { %v3927_v17 = vadd.f32 %v1066_v5, %v896_v7  ;;  %v891_v8 = vadd.f32 %v3924_v4, %v890_v59 }
 0x1a8   : > { %v3228_v9 = vpop.f32.mrf.mxu1 }
 0x1a9   : > { %v1317_v10 = vsel %vm1309_vm2, %v3927_v17, -inf  ;;  %v3932_v11 = vadd.f32 %v1059_v2, %v891_v8  ;;  %v906_v12 = vadd.f32 %v3228_v9, %v3924_v4 }
 0x1aa   : > { %v1318_v13 = vrot.slane %v1317_v10, 4  ;;  %v900_v14 = vpop.f32.mrf.mxu1 }
 0x1ab   : > { %v1310_v16 = vsel %vm1309_vm2, %v3932_v11, -inf  ;;  %v3937_v18 = vadd.f32 %v1080_v6, %v906_v12  ;;  %v901_v19 = vadd.f32 %v3924_v4, %v900_v14 }
 0x1ac   : > { %v1319_v20 = vmax.f32 %v1317_v10, %v1318_v13  ;;  %v1311_v21 = vrot.slane %v1310_v16, 4  ;;  %v3231_v22 = vpop.f32.mrf.mxu1 }
 0x1ad   : > { %v1331_v25 = vsel %vm1309_vm2, %v3937_v18, -inf  ;;  %v3942_v26 = vadd.f32 %v1073_v3, %v901_v19  ;;  %v916_v27 = vadd.f32 %v3231_v22, %v3924_v4  ;;  %v1122_v3 = vpop.permute.xlu1 %1121 }
 0x1ae   : > { %v1320_v28 = vrot.slane %v1319_v20, 2  ;;  %v1312_v29 = vmax.f32 %v1310_v16, %v1311_v21  ;;  %v1332_v30 = vrot.slane %v1331_v25, 4  ;;  %v910_v31 = vpop.f32.mrf.mxu1 }
 0x1af   : > { %v1324_v32 = vsel %vm1309_vm2, %v3942_v26, -inf  ;;  %v3947_v33 = vadd.f32 %v1094_v15, %v916_v27  ;;  %v911_v34 = vadd.f32 %v3924_v4, %v910_v31 }
 0x1b0   : > { %v1321_v35 = vmax.f32 %v1319_v20, %v1320_v28  ;;  %v3234_v36 = vpop.f32.mrf.mxu1  ;;  %v1313_v41 = vrot.slane %v1312_v29, 2  ;;  %v1333_v42 = vmax.f32 %v1331_v25, %v1332_v30  ;;  %v1325_v43 = vrot.slane %v1324_v32, 4  ;;  %v1115_v25 = vpop.permute.xlu0 %1114 }
 0x1b1   : > { %v1345_v38 = vsel %vm1309_vm2, %v3947_v33, -inf  ;;  %v3952_v39 = vadd.f32 %v1087_v23, %v911_v34  ;;  %v926_v40 = vadd.f32 %v3234_v36, %v3924_v4  ;;  %v1136_v27 = vpop.permute.xlu1 %1135 }
 0x1b2   : > { %v920_v44 = vpop.f32.mrf.mxu1  ;;  %v1346_v46 = vrot.slane %v1345_v38, 4  ;;  %v1322_v50 = vrot.slane %v1321_v35, 1  ;;  %v1314_v56 = vmax.f32 %v1312_v29, %v1313_v41  ;;  %v1334_v57 = vrot.slane %v1333_v42, 2 }
 0x1b3   : > { %v1338_v47 = vsel %vm1309_vm2, %v3952_v39, -inf  ;;  %v3957_v48 = vadd.f32 %v1108_v37, %v926_v40  ;;  %v921_v49 = vadd.f32 %v3924_v4, %v920_v44  ;;  %v1326_v58 = vmax.f32 %v1324_v32, %v1325_v43 }
 0x1b4   : > { %v1347_v51 = vmax.f32 %v1345_v38, %v1346_v46  ;;  %v1339_v52 = vrot.slane %v1338_v47, 4  ;;  %v3237_v55 = vpop.f32.mrf.mxu1  ;;  %v1323_v2 = vmax.f32 %v1321_v35, %v1322_v50  ;;  %v1315_v60 = vrot.slane %v1314_v56, 1  ;;  %v1129_v50 = vpop.permute.xlu0 %1128 }
 0x1b5   : > { %v1359_v53 = vsel %vm1309_vm2, %v3957_v48, -inf  ;;  %v3962_v54 = vadd.f32 %v1101_v45, %v921_v49  ;;  %v1335_v6 = vmax.f32 %v1333_v42, %v1334_v57  ;;  %v1327_v7 = vrot.slane %v1326_v58, 2 }
 0x1b6   : > { %v1348_v61 = vrot.slane %v1347_v51, 2  ;;  %v1340_v62 = vmax.f32 %v1338_v47, %v1339_v52  ;;  %v1360_v63 = vrot.slane %v1359_v53, 4  ;;  %v930_v5 = vpop.f32.mrf.mxu1  ;;  %v936_v12 = vadd.f32 %v3237_v55, %v3924_v4 }
 0x1b7   : > { %v1352_v0 = vsel %vm1309_vm2, %v3962_v54, -inf  ;;  %v1535_v13 = vsub.f32 %v3927_v17, %v1323_v2  ;;  %v1316_v15 = vmax.f32 %v1314_v56, %v1315_v60  ;;  %v931_v19 = vadd.f32 %v3924_v4, %v930_v5 }
 0x1b8   : > { %v1349_v59 = vmax.f32 %v1347_v51, %v1348_v61  ;;  %v1353_v8 = vrot.slane %v1352_v0, 4  ;;  %v1341_v9 = vrot.slane %v1340_v62, 2  ;;  %v1361_v10 = vmax.f32 %v1359_v53, %v1360_v63  ;;  %v3240_v14 = vpop.f32.mrf.mxu1 }
 0x1b9   : > { %v3968_v16 = vadd.f32 %v1122_v3, %v936_v12  ;;  %v1336_v20 = vrot.slane %v1335_v6, 1  ;;  %v1328_v21 = vmax.f32 %v1326_v58, %v1327_v7  ;;  %v946_v31 = vadd.f32 %v3240_v14, %v3924_v4  ;;  %v1150_v3 = vpop.permute.xlu1 %1149 }
 0x1ba   : > { %v1350_v22 = vrot.slane %v1349_v59, 1  ;;  %v1354_v23 = vmax.f32 %v1352_v0, %v1353_v8  ;;  %v1342_v28 = vmax.f32 %v1340_v62, %v1341_v9  ;;  %v1362_v29 = vrot.slane %v1361_v10, 2  ;;  %v940_v36 = vpop.f32.mrf.mxu1 }
 0x1bb   : > { %v1373_v30 = vsel %vm1309_vm2, %v3968_v16, -inf  ;;  %v1568_v17 = vmul.f32 1.442695, %v1535_v13  ;;  %v3974_v34 = vadd.f32 %v1115_v25, %v931_v19  ;;  %v3976_v35 = vadd.f32 %v1136_v27, %v946_v31 }
 0x1bc   : > { %v1374_v32 = vrot.slane %v1373_v30, 4  ;;  %v1534_v37 = vsub.f32 %v3932_v11, %v1316_v15  ;;  %v1337_v38 = vmax.f32 %v1335_v6, %v1336_v20  ;;  %v1329_v40 = vrot.slane %v1328_v21, 1  ;;  %v3243_v51 = vpop.f32.mrf.mxu1 }
 0x1bd   : > { %v1355_v41 = vrot.slane %v1354_v23, 2  ;;  %v1351_v42 = vmax.f32 %v1349_v59, %v1350_v22  ;;  %v1343_v43 = vrot.slane %v1342_v28, 1  ;;  %v1363_v44 = vmax.f32 %v1361_v10, %v1362_v29 }
 0x1be   : > { %3380 = vpow2.f32 %v1568_v17  ;;  %v941_v45 = vadd.f32 %v3924_v4, %v940_v36  ;;  %v1375_v46 = vmax.f32 %v1373_v30, %v1374_v32  ;;  %v1366_v47 = vsel %vm1309_vm2, %v3974_v34, -inf }
 0x1bf   : > { %v1387_v49 = vsel %vm1309_vm2, %v3976_v35, -inf  ;;  %v1566_v52 = vmul.f32 1.442695, %v1534_v37  ;;  %v1537_v11 = vsub.f32 %v3937_v18, %v1337_v38  ;;  %v1330_v53 = vmax.f32 %v1328_v21, %v1329_v40  ;;  %v950_v18 = vpop.f32.mrf.mxu1 }
 0x1c0   : > { %v1356_v55 = vmax.f32 %v1354_v23, %v1355_v41  ;;  %v1539_v56 = vsub.f32 %v3947_v33, %v1351_v42  ;;  %v1344_v57 = vmax.f32 %v1342_v28, %v1343_v43  ;;  %v1364_v58 = vrot.slane %v1363_v44, 1  ;;  %v1164_v43 = vpop.permute.xlu1 %1163 }
 0x1c1   : > { %v1367_v61 = vrot.slane %v1366_v47, 4  ;;  %v1388_v62 = vrot.slane %v1387_v49, 4  ;;  %v3986_v63 = vadd.f32 %v1129_v50, %v941_v45  ;;  %v956_v0 = vadd.f32 %v3243_v51, %v3924_v4  ;;  %v3246_v13 = vpop.f32.mrf.mxu1 }
 0x1c2   : > { %v1376_v2 = vrot.slane %v1375_v46, 2  ;;  %3382 = vpow2.f32 %v1566_v52  ;;  %v1572_v5 = vmul.f32 1.442695, %v1537_v11  ;;  %v1536_v60 = vsub.f32 %v3942_v26, %v1330_v53 }
 0x1c3   : > { %v1357_v6 = vrot.slane %v1356_v55, 1  ;;  %v1576_v7 = vmul.f32 1.442695, %v1539_v56  ;;  %v1538_v59 = vsub.f32 %v3952_v39, %v1344_v57  ;;  %v1365_v33 = vmax.f32 %v1363_v44, %v1364_v58  ;;  %v1143_v39 = vpop.permute.xlu0 %1142  ;;  %v960_v28 = vpop.f32.mrf.mxu1 }
 0x1c4   : > { %v1368_v8 = vmax.f32 %v1366_v47, %v1367_v61  ;;  %v1389_v9 = vmax.f32 %v1387_v49, %v1388_v62  ;;  %v1380_v10 = vsel %vm1309_vm2, %v3986_v63, -inf  ;;  %v3993_v12 = vadd.f32 %v1150_v3, %v956_v0  ;;  %v1178_v58 = vpop.permute.xlu1 %1177 }
 0x1c5   : > { %v1377_v14 = vmax.f32 %v1375_v46, %v1376_v2  ;;  %3384 = vpow2.f32 %v1572_v5  ;;  %v1570_v15 = vmul.f32 1.442695, %v1536_v60  ;;  %v1358_v19 = vmax.f32 %v1356_v55, %v1357_v6 }
 0x1c6   : > { %v1574_v20 = vmul.f32 1.442695, %v1538_v59  ;;  %v1541_v26 = vsub.f32 %v3957_v48, %v1365_v33  ;;  %v1381_v21 = vrot.slane %v1380_v10, 4  ;;  %v951_v22 = vadd.f32 %v3924_v4, %v950_v18  ;;  %v3249_v48 = vpop.f32.mrf.mxu1 }
 0x1c7   : > { %3386 = vpow2.f32 %v1576_v7  ;;  %v1369_v23 = vrot.slane %v1368_v8, 2  ;;  %v1390_v25 = vrot.slane %v1389_v9, 2  ;;  %v1401_v27 = vsel %vm1309_vm2, %v3993_v12, -inf  ;;  %v1157_v44 = vpop.permute.xlu0 %1156 }
 0x1c8   : > { %v1378_v30 = vrot.slane %v1377_v14, 1  ;;  %3388 = vpow2.f32 %v1570_v15  ;;  %v1540_v31 = vsub.f32 %v3962_v54, %v1358_v19  ;;  %v4002_v17 = vadd.f32 %v1143_v39, %v951_v22  ;;  %v970_v49 = vpop.f32.mrf.mxu1 }
 0x1c9   : > { %3390 = vpow2.f32 %v1574_v20  ;;  %v1580_v32 = vmul.f32 1.442695, %v1541_v26  ;;  %v1382_v36 = vmax.f32 %v1380_v10, %v1381_v21  ;;  %v1402_v37 = vrot.slane %v1401_v27, 4 }
 0x1ca   : > { %v1370_v40 = vmax.f32 %v1368_v8, %v1369_v23  ;;  %v1391_v41 = vmax.f32 %v1389_v9, %v1390_v25  ;;  %v1394_v42 = vsel %vm1309_vm2, %v4002_v17, -inf  ;;  %v1379_v45 = vmax.f32 %v1377_v14, %v1378_v30  ;;  %v3252_v23 = vpop.f32.mrf.mxu1 }
 0x1cb   : > { %v3999_v29 = vpop.eup %3380  ;;  %v1578_v46 = vmul.f32 1.442695, %v1540_v31  ;;  %v1395_v54 = vrot.slane %v1394_v42, 4  ;;  %v966_v47 = vadd.f32 %v3246_v13, %v3924_v4  ;;  %3392 = vpow2.f32 %v1580_v32  ;;  %v1171_v61 = vpop.permute.xlu0 %1170 }
 0x1cc   : > { %v1637_v38 = vsel %vm1309_vm2, %v3999_v29, 0.0  ;;  %v1383_v52 = vrot.slane %v1382_v36, 2  ;;  %v1403_v11 = vmax.f32 %v1401_v27, %v1402_v37  ;;  %v1371_v53 = vrot.slane %v1370_v40, 1 }
 0x1cd   : > { %v1638_v51 = vrot.slane %v1637_v38, 4  ;;  %v1392_v55 = vrot.slane %v1391_v41, 1  ;;  %v961_v56 = vadd.f32 %v3924_v4, %v960_v28  ;;  %v4012_v57 = vadd.f32 %v1164_v43, %v966_v47 }
 0x1ce   : > { %v1543_v62 = vsub.f32 %v3968_v16, %v1379_v45  ;;  %v1396_v0 = vmax.f32 %v1394_v42, %v1395_v54  ;;  %v976_v2 = vadd.f32 %v3249_v48, %v3924_v4  ;;  %v971_v3 = vadd.f32 %v3924_v4, %v970_v49  ;;  %v980_v54 = vpop.f32.mrf.mxu1 }
 0x1cf   : > { %v4009_v50 = vpop.eup %3382  ;;  %3394 = vpow2.f32 %v1578_v46  ;;  %v1415_v60 = vsel %vm1309_vm2, %v4012_v57, -inf  ;;  %v4023_v6 = vadd.f32 %v1157_v44, %v961_v56  ;;  %v1404_v7 = vrot.slane %v1403_v11, 2 }
 0x1d0   : > { %v4019_v5 = vsel %vm1309_vm2, %v4009_v50, 0.0  ;;  %v1416_v59 = vrot.slane %v1415_v60, 4  ;;  %v4027_v16 = vadd.f32 %v1178_v58, %v976_v2  ;;  %v4029_v33 = vadd.f32 %v1171_v61, %v971_v3 }
 0x1d1   : > { %v1372_v8 = vmax.f32 %v1370_v40, %v1371_v53  ;;  %v1393_v9 = vmax.f32 %v1391_v41, %v1392_v55  ;;  %v1384_v10 = vmax.f32 %v1382_v36, %v1383_v52  ;;  %v1408_v13 = vsel %vm1309_vm2, %v4023_v6, -inf }
 0x1d2   : > { %v4025_v18 = vpop.eup %3384  ;;  %v1584_v15 = vmul.f32 1.442695, %v1543_v62  ;;  %v1397_v19 = vrot.slane %v1396_v0, 2  ;;  %v1417_v20 = vmax.f32 %v1415_v60, %v1416_v59  ;;  %v1409_v26 = vrot.slane %v1408_v13, 4  ;;  %v1185_v59 = vpop.permute.xlu0 %1184 }
 0x1d3   : > { %v4035_v21 = vadd.f32 %v1638_v51, %v1637_v38  ;;  %v1631_v22 = vrot.slane %v4019_v5, 4  ;;  %v1429_v39 = vsel %vm1309_vm2, %v4027_v16, -inf  ;;  %v1651_v27 = vsel %vm1309_vm2, %v4025_v18, 0.0 }
 0x1d4   : > { %v4033_v14 = vpop.eup %3386  ;;  %v1405_v28 = vmax.f32 %v1403_v11, %v1404_v7  ;;  %v1418_v30 = vrot.slane %v1417_v20, 2  ;;  %v1422_v31 = vsel %vm1309_vm2, %v4029_v33, -inf  ;;  %v1542_v36 = vsub.f32 %v3974_v34, %v1372_v8 }
 0x1d5   : > { %v4040_v25 = vpop.eup %3388  ;;  %v1665_v32 = vsel %vm1309_vm2, %v4033_v14, 0.0  ;;  %v1385_v37 = vrot.slane %v1384_v10, 1  ;;  %v1410_v38 = vmax.f32 %v1408_v13, %v1409_v26  ;;  %3396 = vpow2.f32 %v1584_v15 }
 0x1d6   : > { %v4046_v48 = vpop.eup %3390  ;;  %v1545_v40 = vsub.f32 %v3976_v35, %v1393_v9  ;;  %v1398_v41 = vmax.f32 %v1396_v0, %v1397_v19  ;;  %v1430_v42 = vrot.slane %v1429_v39, 4  ;;  %v1640_v43 = vrot.slane %v4035_v21, 2  ;;  %v1192_v0 = vpop.permute.xlu1 %1191 }
 0x1d7   : > { %v1652_v44 = vrot.slane %v1651_v27, 4  ;;  %v1644_v45 = vsel %vm1309_vm2, %v4040_v25, 0.0  ;;  %v1423_v46 = vrot.slane %v1422_v31, 4  ;;  %v1666_v47 = vrot.slane %v1665_v32, 4  ;;  %v3255_v19 = vpop.f32.mrf.mxu1 }
 0x1d8   : > { %v1658_v49 = vsel %vm1309_vm2, %v4046_v48, 0.0  ;;  %v1406_v34 = vrot.slane %v1405_v28, 1  ;;  %v1419_v51 = vmax.f32 %v1417_v20, %v1418_v30  ;;  %v4057_v52 = vpop.eup %3392  ;;  %v1582_v11 = vmul.f32 1.442695, %v1542_v36 }
 0x1d9   : > { %v1386_v35 = vmax.f32 %v1384_v10, %v1385_v37  ;;  %v1411_v53 = vrot.slane %v1410_v38, 2  ;;  %v986_v55 = vadd.f32 %v3252_v23, %v3924_v4  ;;  %v1588_v56 = vmul.f32 1.442695, %v1545_v40 }
 0x1da   : > { %v1399_v58 = vrot.slane %v1398_v41, 1  ;;  %v1431_v61 = vmax.f32 %v1429_v39, %v1430_v42  ;;  %v981_v62 = vadd.f32 %v3924_v4, %v980_v54  ;;  %v1653_v2 = vadd.f32 %v1652_v44, %v1651_v27 }
 0x1db   : > { %v1645_v3 = vrot.slane %v1644_v45, 4  ;;  %v1659_v60 = vrot.slane %v1658_v49, 4  ;;  %v1424_v7 = vmax.f32 %v1422_v31, %v1423_v46  ;;  %v4063_v9 = vadd.f32 %v1666_v47, %v1665_v32 }
 0x1dc   : > { %v4061_v8 = vpop.eup %3394  ;;  %v1679_v10 = vsel %vm1309_vm2, %v4057_v52, 0.0  ;;  %v1407_v13 = vmax.f32 %v1405_v28, %v1406_v34  ;;  %v1420_v15 = vrot.slane %v1419_v51, 1  ;;  %3398 = vpow2.f32 %v1582_v11 }
 0x1dd   : > { %v1544_v20 = vsub.f32 %v3986_v63, %v1386_v35  ;;  %v1412_v26 = vmax.f32 %v1410_v38, %v1411_v53  ;;  %v4068_v39 = vadd.f32 %v1192_v0, %v986_v55  ;;  %3400 = vpow2.f32 %v1588_v56  ;;  %v990_v38 = vpop.f32.mrf.mxu1  ;;  %v1199_v56 = vpop.permute.xlu0 %1198 }
 0x1de   : > { %v1400_v23 = vmax.f32 %v1398_v41, %v1399_v58  ;;  %v1432_v27 = vrot.slane %v1431_v61, 2  ;;  %v4070_v30 = vadd.f32 %v1185_v59, %v981_v62  ;;  %v1632_v31 = vadd.f32 %v1631_v22, %v4019_v5  ;;  %v1206_v59 = vpop.permute.xlu1 %1205 }
 0x1df   : > { %v4073_v32 = vadd.f32 %v1659_v60, %v1658_v49  ;;  %v1680_v36 = vrot.slane %v1679_v10, 4  ;;  %v1425_v37 = vrot.slane %v1424_v7, 2  ;;  %v1654_v28 = vrot.slane %v1653_v2, 2 }
 0x1e0   : > { %v4075_v40 = vadd.f32 %v1645_v3, %v1644_v45  ;;  %v1547_v42 = vsub.f32 %v3993_v12, %v1407_v13  ;;  %v1421_v63 = vmax.f32 %v1419_v51, %v1420_v15  ;;  %v1668_v44 = vrot.slane %v4063_v9, 2 }
 0x1e1   : > { %v1586_v46 = vmul.f32 1.442695, %v1544_v20  ;;  %v1413_v41 = vrot.slane %v1412_v26, 1  ;;  %v1443_v54 = vsel %vm1309_vm2, %v4068_v39, -inf  ;;  %v1672_v5 = vsel %vm1309_vm2, %v4061_v8, 0.0 }
 0x1e2   : > { %v1546_v22 = vsub.f32 %v4002_v17, %v1400_v23  ;;  %v1433_v47 = vmax.f32 %v1431_v61, %v1432_v27  ;;  %v1436_v45 = vsel %vm1309_vm2, %v4070_v30, -inf  ;;  %v4086_v49 = vpop.eup %3396  ;;  %v1661_v12 = vrot.slane %v4073_v32, 2 }
 0x1e3   : > { %v4089_v34 = vadd.f32 %v1680_v36, %v1679_v10  ;;  %v1426_v51 = vmax.f32 %v1424_v7, %v1425_v37  ;;  %v991_v11 = vadd.f32 %v3924_v4, %v990_v38  ;;  %v1592_v35 = vmul.f32 1.442695, %v1547_v42 }
 0x1e4   : > { %v1549_v53 = vsub.f32 %v4012_v57, %v1421_v63  ;;  %v1444_v55 = vrot.slane %v1443_v54, 4  ;;  %v1641_v17 = vadd.f32 %v1640_v43, %v4035_v21  ;;  %v1673_v58 = vrot.slane %v1672_v5, 4 }
 0x1e5   : > { %v1414_v61 = vmax.f32 %v1412_v26, %v1413_v41  ;;  %v1437_v62 = vrot.slane %v1436_v45, 4  ;;  %v996_v0 = vadd.f32 %v3255_v19, %v3924_v4  ;;  %v1693_v3 = vsel %vm1309_vm2, %v4086_v49, 0.0 }
 0x1e6   : > { %3402 = vpow2.f32 %v1586_v46  ;;  %v1590_v60 = vmul.f32 1.442695, %v1546_v22  ;;  %v1434_v7 = vrot.slane %v1433_v47, 1  ;;  %v1427_v10 = vrot.slane %v1426_v51, 1 }
 0x1e7   : > { %v4099_v57 = vadd.f32 %v1199_v56, %v991_v11  ;;  %v1642_v13 = vrot.slane %v1641_v17, 1  ;;  %v1633_v15 = vrot.slane %v1632_v31, 2  ;;  %3404 = vpow2.f32 %v1592_v35 }
 0x1e8   : > { %v1596_v20 = vmul.f32 1.442695, %v1549_v53  ;;  %v1445_v21 = vmax.f32 %v1443_v54, %v1444_v55  ;;  %v1655_v43 = vadd.f32 %v1654_v28, %v1653_v2  ;;  %v1548_v26 = vsub.f32 %v4023_v6, %v1414_v61  ;;  %v1220_v61 = vpop.permute.xlu1 %1219 }
 0x1e9   : > { %v1438_v23 = vmax.f32 %v1436_v45, %v1437_v62  ;;  %v4102_v19 = vadd.f32 %v1206_v59, %v996_v0  ;;  %v1643_v27 = vadd.f32 %v1642_v13, %v1641_v17  ;;  %v4104_v36 = vpop.eup %3398  ;;  %v1682_v37 = vrot.slane %v4089_v34, 2  ;;  %v3258_v45 = vpop.f32.mrf.mxu1 }
 0x1ea   : > { %v1694_v42 = vrot.slane %v1693_v3, 4  ;;  %3406 = vpow2.f32 %v1590_v60  ;;  %v1634_v63 = vadd.f32 %v1633_v15, %v1632_v31  ;;  %v4107_v38 = vpop.eup %3400  ;;  %v1435_v46 = vmax.f32 %v1433_v47, %v1434_v7 }
 0x1eb   : > { %v1428_v41 = vmax.f32 %v1426_v51, %v1427_v10  ;;  %v1450_v2 = vsel %vm1309_vm2, %v4099_v57, -inf  ;;  %3408 = vrcp.f32 %v1643_v27  ;;  %v4111_v6 = vadd.f32 %v1673_v58, %v1672_v5  ;;  %v1000_v7 = vpop.f32.mrf.mxu1 }
 0x1ec   : > { %v1446_v28 = vrot.slane %v1445_v21, 2  ;;  %v1635_v54 = vrot.slane %v1634_v63, 1  ;;  %v1656_v22 = vrot.slane %v1655_v43, 1  ;;  %3410 = vpow2.f32 %v1596_v20 }
 0x1ed   : > { %v1594_v11 = vmul.f32 1.442695, %v1548_v26  ;;  %v1439_v35 = vrot.slane %v1438_v23, 2  ;;  %v1457_v31 = vsel %vm1309_vm2, %v4102_v19, -inf  ;;  %v1686_v47 = vsel %vm1309_vm2, %v4104_v36, 0.0 }
 0x1ee   : > { %v1707_v51 = vsel %vm1309_vm2, %v4107_v38, 0.0  ;;  %v1451_v53 = vrot.slane %v1450_v2, 4  ;;  %v1006_v5 = vadd.f32 %v3258_v45, %v3924_v4  ;;  %v4120_v55 = vadd.f32 %v1694_v42, %v1693_v3  ;;  %v4132_v42 = vpop.f32.mrf.mxu1 }
 0x1ef   : > { %v1551_v56 = vsub.f32 %v4027_v16, %v1435_v46  ;;  %v1550_v17 = vsub.f32 %v4029_v33, %v1428_v41  ;;  %v1636_v58 = vadd.f32 %v1635_v54, %v1634_v63  ;;  %v1447_v62 = vmax.f32 %v1445_v21, %v1446_v28  ;;  %v1213_v41 = vpop.permute.xlu0 %1212 }
 0x1f0   : > { %v1458_v0 = vrot.slane %v1457_v31, 4  ;;  %v1657_v60 = vadd.f32 %v1656_v22, %v1655_v43  ;;  %v1647_v59 = vrot.slane %v4075_v40, 2  ;;  %v1687_v10 = vrot.slane %v1686_v47, 4 }
 0x1f1   : > { %v1708_v13 = vrot.slane %v1707_v51, 4  ;;  %3412 = vpow2.f32 %v1594_v11  ;;  %v1440_v15 = vmax.f32 %v1438_v23, %v1439_v35  ;;  %v1452_v20 = vmax.f32 %v1450_v2, %v1451_v53 }
 0x1f2   : > { %3414 = vrcp.f32 %v1636_v58  ;;  %v1648_v3 = vadd.f32 %v1647_v59, %v4075_v40  ;;  %v4126_v26 = vadd.f32 %v1220_v61, %v1006_v5  ;;  %v1675_v33 = vrot.slane %v4111_v6, 2 }
 0x1f3   : > { %v4128_v16 = vpop.eup %3402  ;;  %v1600_v21 = vmul.f32 1.442695, %v1551_v56  ;;  %v1598_v27 = vmul.f32 1.442695, %v1550_v17  ;;  %v1001_v43 = vadd.f32 %v3924_v4, %v1000_v7  ;;  %v1448_v63 = vrot.slane %v1447_v62, 1 }
 0x1f4   : > { %v1459_v46 = vmax.f32 %v1457_v31, %v1458_v0  ;;  %3416 = vrcp.f32 %v1657_v60  ;;  %v1649_v23 = vrot.slane %v1648_v3, 1  ;;  %v4134_v2 = vpop.eup %3404  ;;  %v1696_v40 = vrot.slane %v4120_v55, 2 }
 0x1f5   : > { %v4137_v28 = vadd.f32 %v1687_v10, %v1686_v47  ;;  %v4139_v54 = vadd.f32 %v1708_v13, %v1707_v51  ;;  %v1471_v22 = vsel %vm1309_vm2, %v4126_v26, -inf  ;;  %v1700_v45 = vsel %vm1309_vm2, %v4128_v16, 0.0  ;;  %v1010_v51 = vpop.f32.mrf.mxu1 }
 0x1f6   : > { %v1441_v11 = vrot.slane %v1440_v15, 1  ;;  %v1453_v35 = vrot.slane %v1452_v20, 2  ;;  %v1650_v31 = vadd.f32 %v1649_v23, %v1648_v3  ;;  %3418 = vpow2.f32 %v1600_v21  ;;  %v1227_v21 = vpop.permute.xlu0 %1226 }
 0x1f7   : > { %v4145_v53 = vpop.eup %3406  ;;  %v1472_v5 = vrot.slane %v1471_v22, 4  ;;  %v4147_v56 = vadd.f32 %v1213_v41, %v1001_v43  ;;  %v1669_v47 = vadd.f32 %v1668_v44, %v4063_v9  ;;  %v1721_v58 = vsel %vm1309_vm2, %v4134_v2, 0.0 }
 0x1f8   : > { %v3409_v17 = vpop.eup %3408  ;;  %3420 = vpow2.f32 %v1598_v27  ;;  %v1449_v61 = vmax.f32 %v1447_v62, %v1448_v63  ;;  %v1460_v0 = vrot.slane %v1459_v46, 2  ;;  %v1714_v9 = vsel %vm1309_vm2, %v4145_v53, 0.0 }
 0x1f9   : > { %v1919_v60 = vmul.f32 %v3409_v17, %v3999_v29  ;;  %3422 = vrcp.f32 %v1650_v31  ;;  %v1464_v7 = vsel %vm1309_vm2, %v4147_v56, -inf  ;;  %v1670_v59 = vrot.slane %v1669_v47, 1  ;;  %v4157_v10 = vpop.eup %3410 }
 0x1fa   : > { %v1442_v44 = vmax.f32 %v1440_v15, %v1441_v11  ;;  %v1454_v13 = vmax.f32 %v1452_v20, %v1453_v35  ;;  %v1011_v3 = vadd.f32 %v3924_v4, %v1010_v51  ;;  %v1473_v62 = vmax.f32 %v1471_v22, %v1472_v5 }
 0x1fb   : > { %2559 = vperm.xlu0 %3334, %v1919_v60   ;;  %2352 = vperm.xlu1 %3333, %v1919_v60   ;;  %v1465_v27 = vrot.slane %v1464_v7, 4  ;;  %v1671_v29 = vadd.f32 %v1670_v59, %v1669_v47  ;;  %v1662_v43 = vadd.f32 %v1661_v12, %v4073_v32  ;;  %v1701_v23 = vrot.slane %v1700_v45, 4  ;;  %v4174_v12 = vpop.f32.mrf.mxu1 }
 0x1fc   : > { %v1722_v41 = vrot.slane %v1721_v58, 4  ;;  %v1461_v31 = vmax.f32 %v1459_v46, %v1460_v0  ;;  %v1715_v17 = vrot.slane %v1714_v9, 4  ;;  %v1735_v15 = vsel %vm1309_vm2, %v4157_v10, 0.0 }
 0x1fd   : > { %v1553_v20 = vsub.f32 %v4068_v39, %v1449_v61  ;;  %v4169_v11 = vadd.f32 %v1227_v21, %v1011_v3  ;;  %v1552_v35 = vsub.f32 %v4070_v30, %v1442_v44  ;;  %v1455_v5 = vrot.slane %v1454_v13, 1 }
 0x1fe   : > { %v4171_v22 = vpop.eup %3412  ;;  %3424 = vrcp.f32 %v1671_v29  ;;  %v1663_v32 = vrot.slane %v1662_v43, 1  ;;  %v1474_v46 = vrot.slane %v1473_v62, 2  ;;  %v1466_v51 = vmax.f32 %v1464_v7, %v1465_v27 }
 0x1ff   : > { %v3415_v47 = vpop.eup %3414  ;;  %3335 = vset.pattern.permute.xlu0 %v4866_v24  ;;  %3336 = vset.pattern.permute.xlu1 %v4864_v1  ;;  %v1478_v39 = vsel %vm1309_vm2, %v4169_v11, -inf  ;;  %v1683_v61 = vadd.f32 %v1682_v37, %v4089_v34  ;;  %v4183_v30 = vadd.f32 %v1701_v23, %v1700_v45  ;;  %v1736_v0 = vrot.slane %v1735_v15, 4  ;;  %v1020_v34 = vpop.f32.mrf.mxu1 }
 0x200   : > { %v1462_v60 = vrot.slane %v1461_v31, 1  ;;  %v1918_v59 = vmul.f32 %v3415_v47, %v4009_v50  ;;  %v4186_v3 = vadd.f32 %v1722_v41, %v1721_v58  ;;  %v1604_v21 = vmul.f32 1.442695, %v1553_v20 }
 0x201   : > { %v3417_v44 = vpop.eup %3416  ;;  %v1479_v29 = vrot.slane %v1478_v39, 4  ;;  %v1664_v63 = vadd.f32 %v1663_v32, %v1662_v43  ;;  %v4188_v7 = vadd.f32 %v1715_v17, %v1714_v9  ;;  %v1728_v27 = vsel %vm1309_vm2, %v4171_v22, 0.0 }
 0x202   : > { %v1602_v1 = vmul.f32 1.442695, %v1552_v35  ;;  %v1456_v24 = vmax.f32 %v1454_v13, %v1455_v5  ;;  %2159 = vperm.xlu1 %3336, %v1918_v59   ;;  %1952 = vperm.xlu0 %3335, %v1918_v59   ;;  %v1475_v37 = vmax.f32 %v1473_v62, %v1474_v46  ;;  %v1467_v45 = vrot.slane %v1466_v51, 2  ;;  %v4202_v13 = vpop.f32.mrf.mxu1 }
 0x203   : > { %3426 = vrcp.f32 %v1664_v63  ;;  %v1684_v50 = vrot.slane %v1683_v61, 1  ;;  %v4192_v23 = vpop.eup %3418  ;;  %v4194_v58 = vadd.f32 %v1736_v0, %v1735_v15  ;;  %v4196_v41 = vmax.f32 %v1461_v31, %v1462_v60 }
 0x204   : > { %v1921_v9 = vmul.f32 %v3417_v44, %v4025_v18  ;;  %v1676_v43 = vadd.f32 %v1675_v33, %v4111_v6  ;;  %v1710_v62 = vrot.slane %v4139_v54, 2  ;;  %v1729_v63 = vrot.slane %v1728_v27, 4  ;;  %v4210_v6 = vpop.permute.xlu1 %1233 }
 0x205   : > { %v4204_v17 = vpop.eup %3420  ;;  %3428 = vpow2.f32 %v1604_v21  ;;  %v1480_v20 = vmax.f32 %v1478_v39, %v1479_v29  ;;  %v1703_v15 = vrot.slane %v4183_v30, 2  ;;  %v1554_v33 = vsub.f32 %v4099_v57, %v1456_v24 }
 0x206   : > { %v3423_v35 = vpop.eup %3422  ;;  %3430 = vpow2.f32 %v1602_v1  ;;  %2563 = vperm.xlu1 %3336, %v1921_v9   ;;  %2357 = vperm.xlu0 %3335, %v1921_v9   ;;  %v1476_v5 = vrot.slane %v1475_v37, 1  ;;  %v1468_v32 = vmax.f32 %v1466_v51, %v1467_v45  ;;  %v1685_v47 = vadd.f32 %v1684_v50, %v1683_v61  ;;  %v1030_v1 = vpop.f32.mrf.mxu1 }
 0x207   : > { %v1555_v39 = vsub.f32 %v4102_v19, %v4196_v41  ;;  %v1677_v0 = vrot.slane %v1676_v43, 1  ;;  %v1697_v60 = vadd.f32 %v1696_v40, %v4120_v55  ;;  %v4219_v59 = vadd.f32 %v1729_v63, %v1728_v27  ;;  %v1241_v27 = vpop.permute.xlu0 %1240 }
 0x208   : > { %v1920_v44 = vmul.f32 %v3423_v35, %v4040_v25  ;;  %v1481_v21 = vrot.slane %v1480_v20, 2  ;;  %3432 = vrcp.f32 %v1685_v47  ;;  %v4224_v24 = vsel %vm1309_vm2, %v4192_v23, 0.0  ;;  %v1248_v29 = vpop.permute.xlu1 %1247 }
 0x209   : > { %v4228_v57 = vsel %vm1309_vm2, %v4204_v17, 0.0  ;;  %v4870_v51 = vmov 0   ;;  %v4871_v61 = vmov 1   ;;  %v1678_v55 = vadd.f32 %v1677_v0, %v1676_v43  ;;  %v4238_v0 = vpop.f32.mrf.mxu1 }
 0x20a   : > { %3337 = vset.pattern.permute.xlu1 %v4870_v51  ;;  %3338 = vset.pattern.permute.xlu0 %v4871_v61  ;;  %v1698_v40 = vrot.slane %v1697_v60, 1  ;;  %v1606_v25 = vmul.f32 1.442695, %v1554_v33  ;;  %v1477_v50 = vmax.f32 %v1475_v37, %v1476_v5  ;;  %v1469_v9 = vrot.slane %v1468_v32, 1 }
 0x20b   : > { %v3425_v45 = vpop.eup %3424  ;;  %1957 = vperm.xlu1 %3337, %v1920_v44   ;;  %2163 = vperm.xlu0 %3338, %v1920_v44   ;;  %v1026_v63 = vadd.f32 %v4174_v12, %v3924_v4  ;;  %3434 = vrcp.f32 %v1678_v55  ;;  %v1021_v47 = vadd.f32 %v3924_v4, %v1020_v34  ;;  %v4872_v31 = vrot.slane %v4137_v28, 2 }
 0x20c   : > { %v1699_v35 = vadd.f32 %v1698_v40, %v1697_v60  ;;  %v1482_v44 = vmax.f32 %v1480_v20, %v1481_v21  ;;  %v1923_v5 = vmul.f32 %v3425_v45, %v4033_v14  ;;  %v1711_v34 = vadd.f32 %v1710_v62, %v4139_v54  ;;  %v1255_v60 = vpop.permute.xlu0 %1254  ;;  %v1040_v62 = vpop.f32.mrf.mxu1 }
 0x20d   : > { %v1690_v43 = vadd.f32 %v4872_v31, %v4137_v28  ;;  %v4242_v37 = vadd.f32 %v1248_v29, %v1026_v63  ;;  %v4245_v55 = vadd.f32 %v1241_v27, %v1021_v47  ;;  %3436 = vpow2.f32 %v1606_v25 }
 0x20e   : > { %v1557_v28 = vsub.f32 %v4126_v26, %v1477_v50  ;;  %v1031_v31 = vadd.f32 %v3924_v4, %v1030_v1  ;;  %v1470_v14 = vmax.f32 %v1468_v32, %v1469_v9  ;;  %3438 = vrcp.f32 %v1699_v35  ;;  %v4263_v4 = vld [vmem:[%s4862_s5] ss:$0 sm:$0xff] }
 0x20f   : > { %v1691_v12 = vrot.slane %v1690_v43, 1  ;;  %3340 = vset.pattern.permute.xlu1 %v4871_v61  ;;  %3339 = vset.pattern.permute.xlu0 %v4870_v51  ;;  %v1499_v20 = vsel %vm1309_vm2, %v4242_v37, -inf  ;;  %v1492_v54 = vsel %vm1309_vm2, %v4245_v55, -inf  ;;  %v1712_v27 = vrot.slane %v1711_v34, 1 }
 0x210   : > { %v3427_v21 = vpop.eup %3426  ;;  %2567 = vperm.xlu1 %3340, %v1923_v5   ;;  %2362 = vperm.xlu0 %3339, %v1923_v5   ;;  %v1500_v40 = vrot.slane %v1499_v20, 4  ;;  %v1493_v29 = vrot.slane %v1492_v54, 4  ;;  %v4256_v45 = vadd.f32 %v1255_v60, %v1031_v31  ;;  %v1016_v32 = vadd.f32 %v4263_v4, %v4132_v42 }
 0x211   : > { %v1692_v26 = vadd.f32 %v1691_v12, %v1690_v43  ;;  %v1483_v1 = vrot.slane %v1482_v44, 1  ;;  %v1704_v9 = vadd.f32 %v1703_v15, %v4183_v30  ;;  %v1922_v35 = vmul.f32 %v3427_v21, %v4046_v48  ;;  %v1269_v15 = vpop.permute.xlu0 %1268  ;;  %v1262_v21 = vpop.permute.xlu1 %1261 }
 0x212   : > { %v4258_v25 = vpop.eup %3428  ;;  %v1501_v50 = vmax.f32 %v1499_v20, %v1500_v40  ;;  %v1494_v47 = vmax.f32 %v1492_v54, %v1493_v29  ;;  %v1506_v43 = vsel %vm1309_vm2, %v4256_v45, -inf  ;;  %v1041_v5 = vadd.f32 %v4263_v4, %v1040_v62 }
 0x213   : > { %v4270_v63 = vpop.eup %3430  ;;  %v1612_v12 = vmul.f32 1.442695, %v1557_v28  ;;  %v1036_v60 = vadd.f32 %v4263_v4, %v4202_v13  ;;  %v1507_v30 = vrot.slane %v1506_v43, 4  ;;  %v1556_v20 = vsub.f32 %v4147_v56, %v1470_v14 }
 0x214   : > { %3341 = vset.pattern.permute.xlu1 %v4870_v51  ;;  %3344 = vset.pattern.permute.xlu0 %v4871_v61  ;;  %v1502_v42 = vrot.slane %v1501_v50, 2  ;;  %3440 = vrcp.f32 %v1692_v26  ;;  %v1495_v48 = vrot.slane %v1494_v47, 2  ;;  %v1713_v31 = vadd.f32 %v1712_v27, %v1711_v34 }
 0x215   : > { %1962 = vperm.xlu1 %3341, %v1922_v35   ;;  %v3433_v40 = vpop.eup %3432  ;;  %v1484_v54 = vmax.f32 %v1482_v44, %v1483_v1  ;;  %v1508_v62 = vmax.f32 %v1506_v43, %v1507_v30  ;;  %v1705_v29 = vrot.slane %v1704_v9, 1  ;;  %v4282_v46 = vadd.f32 %v4210_v6, %v1016_v32 }
 0x216   : > { %v1503_v28 = vmax.f32 %v1501_v50, %v1502_v42  ;;  %v1925_v18 = vmul.f32 %v3433_v40, %v4057_v52  ;;  %v1496_v13 = vmax.f32 %v1494_v47, %v1495_v48  ;;  %v4285_v33 = vadd.f32 %v1269_v15, %v1041_v5 }
 0x217   : > { %3442 = vpow2.f32 %v1612_v12  ;;  %v1509_v14 = vrot.slane %v1508_v62, 2  ;;  %v4287_v26 = vadd.f32 %v1262_v21, %v1036_v60  ;;  %v1763_v44 = vsel %vm1309_vm2, %v4258_v25, 0.0 }
 0x218   : > { %v1504_v56 = vrot.slane %v1503_v28, 1  ;;  %v3435_v34 = vpop.eup %3434  ;;  %v1610_v27 = vmul.f32 1.442695, %v1556_v20  ;;  %2571 = vperm.xlu0 %3344, %v1925_v18   ;;  %v1497_v6 = vrot.slane %v1496_v13, 1  ;;  %3444 = vrcp.f32 %v1713_v31 }
 0x219   : > { %3342 = vset.pattern.permute.xlu1 %v4871_v61  ;;  %v1608_v52 = vmul.f32 1.442695, %v1555_v39  ;;  %v1558_v32 = vsub.f32 %v4169_v11, %v1484_v54  ;;  %v1706_v50 = vadd.f32 %v1705_v29, %v1704_v9  ;;  %v1731_v47 = vrot.slane %v4219_v59, 2 }
 0x21a   : > { %2167 = vperm.xlu1 %3342, %v1922_v35   ;;  %v1505_v1 = vmax.f32 %v1503_v28, %v1504_v56  ;;  %v1485_v43 = vsel %vm1309_vm2, %v4282_v46, -inf  ;;  %v1510_v5 = vmax.f32 %v1508_v62, %v1509_v14  ;;  %v1520_v12 = vsel %vm1309_vm2, %v4285_v33, -inf  ;;  %v4301_v42 = vpop.eup %3436 }
 0x21b   : > { %v4873_v19 = vrot.slane %v4228_v57, 4  ;;  %v1764_v11 = vrot.slane %v1763_v44, 4  ;;  %v1924_v39 = vmul.f32 %v3435_v34, %v4061_v8  ;;  %v1513_v9 = vsel %vm1309_vm2, %v4287_v26, -inf  ;;  %v3439_v35 = vpop.eup %3438 }
 0x21c   : > { %3446 = vpow2.f32 %v1610_v27  ;;  %3345 = vset.pattern.permute.xlu0 %v4870_v51  ;;  %v1561_v60 = vsub.f32 %v4242_v37, %v1505_v1  ;;  %v1498_v30 = vmax.f32 %v1496_v13, %v1497_v6  ;;  %v1521_v15 = vrot.slane %v1520_v12, 4 }
 0x21d   : > { %v4306_v41 = vadd.f32 %v4873_v19, %v4228_v57  ;;  %v1486_v20 = vrot.slane %v1485_v43, 4  ;;  %v1614_v48 = vmul.f32 1.442695, %v1558_v32  ;;  %1967 = vperm.xlu0 %3345, %v1924_v39   ;;  %3448 = vrcp.f32 %v1706_v50 }
 0x21e   : > { %3343 = vset.pattern.permute.xlu1 %v4870_v51  ;;  %v4874_v8 = vrot.slane %v4188_v7, 2  ;;  %v1756_v31 = vsel %vm1309_vm2, %v4270_v63, 0.0  ;;  %v1511_v21 = vrot.slane %v1510_v5, 1  ;;  %v1514_v40 = vrot.slane %v1513_v9, 4 }
 0x21f   : > { %2367 = vperm.xlu1 %3343, %v1925_v18   ;;  %v1522_v54 = vmax.f32 %v1520_v12, %v1521_v15  ;;  %v4875_v37 = vrot.slane %v4224_v24, 4  ;;  %v1765_v62 = vadd.f32 %v1764_v11, %v1763_v44  ;;  %3450 = vpow2.f32 %v1608_v52 }
 0x220   : > { %v1718_v57 = vadd.f32 %v4874_v8, %v4188_v7  ;;  %v1927_v29 = vmul.f32 %v3439_v35, %v4086_v49  ;;  %v1745_v13 = vrot.slane %v4306_v41, 2  ;;  %v1620_v56 = vmul.f32 1.442695, %v1561_v60 }
 0x221   : > { %v4322_v28 = vadd.f32 %v4875_v37, %v4224_v24  ;;  %v1560_v7 = vsub.f32 %v4245_v55, %v1498_v30  ;;  %v1523_v14 = vrot.slane %v1522_v54, 2  ;;  %v3441_v34 = vpop.eup %3440  ;;  %v1757_v18 = vrot.slane %v1756_v31, 4 }
 0x222   : > { %v4327_v27 = vmax.f32 %v1485_v43, %v1486_v20  ;;  %3452 = vpow2.f32 %v1614_v48  ;;  %2372 = vperm.xlu0 %3345, %v1927_v29   ;;  %v1719_v6 = vrot.slane %v1718_v57, 1  ;;  %v1512_v24 = vmax.f32 %v1510_v5, %v1511_v21 }
 0x223   : > { %3346 = vset.pattern.permute.xlu1 %v4871_v61  ;;  %v1515_v44 = vmax.f32 %v1513_v9, %v1514_v40  ;;  %v1524_v52 = vmax.f32 %v1522_v54, %v1523_v14  ;;  %v4876_v49 = vrot.slane %v4194_v58, 2  ;;  %v1766_v1 = vrot.slane %v1765_v62, 2 }
 0x224   : > { %v1770_v55 = vsel %vm1309_vm2, %v4301_v42, 0.0  ;;  %2171 = vperm.xlu1 %3346, %v1924_v39   ;;  %v1720_v50 = vadd.f32 %v1719_v6, %v1718_v57  ;;  %v1732_v43 = vadd.f32 %v1731_v47, %v4219_v59  ;;  %v4336_v12 = vpop.eup %3442  ;;  %3454 = vpow2.f32 %v1620_v56 }
 0x225   : > { %v1739_v32 = vadd.f32 %v4876_v49, %v4194_v58  ;;  %v1926_v19 = vmul.f32 %v3441_v34, %v4104_v36  ;;  %v1618_v5 = vmul.f32 1.442695, %v1560_v7  ;;  %v1525_v11 = vrot.slane %v1524_v52, 1  ;;  %v3445_v9 = vpop.eup %3444 }
 0x226   : > { %3348 = vset.pattern.permute.xlu0 %v4871_v61  ;;  %3456 = vrcp.f32 %v1720_v50  ;;  %v1733_v35 = vrot.slane %v1732_v43, 1  ;;  %v4877_v60 = vrot.slane %v4186_v3, 2  ;;  %v1758_v30 = vadd.f32 %v1757_v18, %v1756_v31 }
 0x227   : > { %v1740_v58 = vrot.slane %v1739_v32, 1  ;;  %v1771_v15 = vrot.slane %v1770_v55, 4  ;;  %2175 = vperm.xlu0 %3348, %v1926_v19   ;;  %v1562_v59 = vsub.f32 %v4256_v45, %v1512_v24  ;;  %v1516_v47 = vrot.slane %v1515_v44, 2 }
 0x228   : > { %v1725_v39 = vadd.f32 %v4877_v60, %v4186_v3  ;;  %2575 = vperm.xlu1 %3346, %v1927_v29   ;;  %v1526_v36 = vmax.f32 %v1524_v52, %v1525_v11  ;;  %v1746_v8 = vadd.f32 %v1745_v13, %v4306_v41  ;;  %v1791_v57 = vsel %vm1309_vm2, %v4336_v12, 0.0 }
 0x229   : > { %v1741_v20 = vadd.f32 %v1740_v58, %v1739_v32  ;;  %3458 = vpow2.f32 %v1618_v5  ;;  %v1929_v21 = vmul.f32 %v3445_v9, %v4107_v38  ;;  %v1734_v40 = vadd.f32 %v1733_v35, %v1732_v43  ;;  %v4348_v3 = vpop.eup %3446 }
 0x22a   : > { %v1726_v48 = vrot.slane %v1725_v39, 1  ;;  %v1747_v54 = vrot.slane %v1746_v8, 1  ;;  %v1767_v45 = vadd.f32 %v1766_v1, %v1765_v62  ;;  %v3449_v37 = vpop.eup %3448  ;;  %v1759_v29 = vrot.slane %v1758_v30, 2 }
 0x22b   : > { %3460 = vrcp.f32 %v1741_v20  ;;  %v1488_v56 = vrot.slane %v4327_v27, 2  ;;  %2579 = vperm.xlu0 %3348, %v1929_v21   ;;  %v1622_v7 = vmul.f32 1.442695, %v1562_v59  ;;  %v1517_v41 = vmax.f32 %v1515_v44, %v1516_v47 }
 0x22c   : > { %v1727_v31 = vadd.f32 %v1726_v48, %v1725_v39  ;;  %v1772_v13 = vadd.f32 %v1771_v15, %v1770_v55  ;;  %3347 = vset.pattern.permute.xlu1 %v4870_v51  ;;  %v1564_v14 = vsub.f32 %v4285_v33, %v1526_v36  ;;  %v4353_v38 = vpop.eup %3450  ;;  %v1792_v34 = vrot.slane %v1791_v57, 4 }
 0x22d   : > { %v1784_v18 = vsel %vm1309_vm2, %v4348_v3, 0.0  ;;  %1972 = vperm.xlu1 %3347, %v1926_v19   ;;  %v1752_v62 = vrot.slane %v4322_v28, 2  ;;  %v1928_v6 = vmul.f32 %v3449_v37, %v4128_v16  ;;  %v1748_v24 = vadd.f32 %v1747_v54, %v1746_v8  ;;  %v1276_v37 = vpop.permute.xlu1 %1275 }
 0x22e   : > { %3462 = vrcp.f32 %v1727_v31  ;;  %v1768_v44 = vrot.slane %v1767_v45, 1  ;;  %v1489_v49 = vmax.f32 %v4327_v27, %v1488_v56  ;;  %v1518_v33 = vrot.slane %v1517_v41, 1 }
 0x22f   : > { %3464 = vrcp.f32 %v1734_v40  ;;  %v4359_v52 = vpop.eup %3452  ;;  %3349 = vset.pattern.permute.xlu0 %v4870_v51  ;;  %v1760_v32 = vadd.f32 %v1759_v29, %v1758_v30  ;;  %v1773_v1 = vrot.slane %v1772_v13, 2  ;;  %v1785_v55 = vrot.slane %v1784_v18, 4 }
 0x230   : > { %3466 = vpow2.f32 %v1622_v7  ;;  %1977 = vperm.xlu0 %3349, %v1928_v6   ;;  %v1626_v50 = vmul.f32 1.442695, %v1564_v14  ;;  %v1793_v43 = vadd.f32 %v1792_v34, %v1791_v57  ;;  %v1769_v16 = vadd.f32 %v1768_v44, %v1767_v45 }
 0x231   : > { %2377 = vperm.xlu1 %3347, %v1929_v21   ;;  %v4363_v19 = vpop.eup %3454  ;;  %3468 = vrcp.f32 %v1748_v24  ;;  %v1753_v5 = vadd.f32 %v1752_v62, %v4322_v28  ;;  %v1490_v9 = vrot.slane %v1489_v49, 1  ;;  %v1798_v27 = vsel %vm1309_vm2, %v4359_v52, 0.0 }
 0x232   : > { %v1519_v58 = vmax.f32 %v1517_v41, %v1518_v33  ;;  %v1761_v35 = vrot.slane %v1760_v32, 1  ;;  %v1786_v60 = vadd.f32 %v1785_v55, %v1784_v18  ;;  %3470 = vpow2.f32 %v1626_v50 }
 0x233   : > { %v3457_v11 = vpop.eup %3456  ;;  %v1774_v30 = vadd.f32 %v1773_v1, %v1772_v13  ;;  %v1794_v15 = vrot.slane %v1793_v43, 2  ;;  %v1799_v28 = vrot.slane %v1798_v27, 4  ;;  %v1819_v47 = vsel %vm1309_vm2, %v4363_v19, 0.0 }
 0x234   : > { %3354 = vset.pattern.permute.xlu0 %v4871_v61  ;;  %v4370_v39 = vmul.f32 %v3457_v11, %v4145_v53  ;;  %3472 = vrcp.f32 %v1769_v16  ;;  %v1754_v36 = vrot.slane %v1753_v5, 1  ;;  %v1491_v48 = vmax.f32 %v1489_v49, %v1490_v9 }
 0x235   : > { %3350 = vset.pattern.permute.xlu1 %v4871_v61  ;;  %v1563_v53 = vsub.f32 %v4287_v26, %v1519_v58  ;;  %v1762_v8 = vadd.f32 %v1761_v35, %v1760_v32  ;;  %v1787_v57 = vrot.slane %v1786_v60, 2  ;;  %v1046_v21 = vadd.f32 %v4263_v4, %v4238_v0 }
 0x236   : > { %v4373_v59 = vpop.eup %3458  ;;  %2183 = vperm.xlu0 %3354, %v4370_v39   ;;  %2179 = vperm.xlu1 %3350, %v1928_v6   ;;  %v1775_v40 = vrot.slane %v1774_v30, 1  ;;  %v1820_v54 = vrot.slane %v1819_v47, 4  ;;  %v1795_v56 = vadd.f32 %v1794_v15, %v1793_v43  ;;  %v1800_v41 = vadd.f32 %v1799_v28, %v1798_v27 }
 0x237   : > { %v1812_v45 = vsel %vm1309_vm2, %v4373_v59, 0.0  ;;  %v1755_v0 = vadd.f32 %v1754_v36, %v1753_v5  ;;  %v1777_v4 = vsel %vm1309_vm2, %v4353_v38, 0.0  ;;  %v1559_v13 = vsub.f32 %v4282_v46, %v1491_v48 }
 0x238   : > { %v3461_v20 = vpop.eup %3460  ;;  %v1624_v14 = vmul.f32 1.442695, %v1563_v53  ;;  %3474 = vrcp.f32 %v1762_v8  ;;  %v1813_v34 = vrot.slane %v1812_v45, 4  ;;  %v4395_v18 = vadd.f32 %v1276_v37, %v1046_v21 }
 0x239   : > { %v4384_v29 = vmul.f32 %v3461_v20, %v4157_v10  ;;  %v1776_v62 = vadd.f32 %v1775_v40, %v1774_v30  ;;  %v1821_v6 = vadd.f32 %v1820_v54, %v1819_v47  ;;  %v1796_v24 = vrot.slane %v1795_v56, 1 }
 0x23a   : > { %3355 = vset.pattern.permute.xlu0 %v4870_v51  ;;  %3351 = vset.pattern.permute.xlu1 %v4870_v51  ;;  %v1788_v44 = vadd.f32 %v1787_v57, %v1786_v60  ;;  %v1778_v49 = vrot.slane %v1777_v4, 4  ;;  %v1801_v33 = vrot.slane %v1800_v41, 2  ;;  %3476 = vrcp.f32 %v1755_v0 }
 0x23b   : > { %v3463_v31 = vpop.eup %3462  ;;  %2387 = vperm.xlu0 %3355, %v4384_v29   ;;  %v1616_v32 = vmul.f32 1.442695, %v1559_v13  ;;  %3478 = vpow2.f32 %v1624_v14  ;;  %v1527_v55 = vsel %vm1309_vm2, %v4395_v18, -inf  ;;  %v1814_v43 = vadd.f32 %v1813_v34, %v1812_v45 }
 0x23c   : > { %v3465_v7 = vpop.eup %3464  ;;  %v1931_v26 = vmul.f32 %v3463_v31, %v4134_v2  ;;  %3480 = vrcp.f32 %v1776_v62  ;;  %v1797_v16 = vadd.f32 %v1796_v24, %v1795_v56  ;;  %v1789_v5 = vrot.slane %v1788_v44, 1 }
 0x23d   : > { %v4393_v10 = vpop.eup %3466  ;;  %v1932_v2 = vmul.f32 %v3465_v7, %v4171_v22  ;;  %v1822_v22 = vrot.slane %v1821_v6, 2  ;;  %v1779_v11 = vadd.f32 %v1778_v49, %v1777_v4  ;;  %v1802_v58 = vadd.f32 %v1801_v33, %v1800_v41 }
 0x23e   : > { %2382 = vperm.xlu1 %3351, %v1931_v26   ;;  %v3469_v46 = vpop.eup %3468  ;;  %v1826_v1 = vsel %vm1309_vm2, %v4393_v10, 0.0  ;;  %3482 = vpow2.f32 %v1616_v32  ;;  %v1528_v60 = vrot.slane %v1527_v55, 4  ;;  %v1815_v15 = vrot.slane %v1814_v43, 2 }
 0x23f   : > { %1987 = vperm.xlu0 %3355, %v1932_v2   ;;  %v4403_v50 = vpop.eup %3470  ;;  %v1827_v9 = vrot.slane %v1826_v1, 4  ;;  %v4406_v27 = vmul.f32 %v3469_v46, %v4204_v17  ;;  %3484 = vrcp.f32 %v1797_v16  ;;  %v1790_v28 = vadd.f32 %v1789_v5, %v1788_v44 }
 0x240   : > { %v1840_v30 = vsel %vm1309_vm2, %v4403_v50, 0.0  ;;  %v1823_v47 = vadd.f32 %v1822_v22, %v1821_v6  ;;  %v1780_v36 = vrot.slane %v1779_v11, 2  ;;  %v1803_v48 = vrot.slane %v1802_v58, 1 }
 0x241   : > { %v3473_v35 = vpop.eup %3472  ;;  %v1828_v17 = vadd.f32 %v1827_v9, %v1826_v1  ;;  %v1841_v53 = vrot.slane %v1840_v30, 4  ;;  %v1529_v8 = vmax.f32 %v1527_v55, %v1528_v60  ;;  %3486 = vrcp.f32 %v1790_v28 }
 0x242   : > { %3352 = vset.pattern.permute.xlu1 %v4871_v61  ;;  %v4414_v20 = vmul.f32 %v3473_v35, %v4258_v25  ;;  %v1824_v21 = vrot.slane %v1823_v47, 1  ;;  %v1816_v40 = vadd.f32 %v1815_v15, %v1814_v43  ;;  %v1804_v54 = vadd.f32 %v1803_v48, %v1802_v58 }
 0x243   : > { %2583 = vperm.xlu1 %3352, %v1931_v26   ;;  %3360 = vset.pattern.permute.xlu0 %v4871_v61  ;;  %v1829_v31 = vrot.slane %v1828_v17, 2  ;;  %v1781_v45 = vadd.f32 %v1780_v36, %v1779_v11  ;;  %v1842_v56 = vadd.f32 %v1841_v53, %v1840_v30  ;;  %v1530_v25 = vrot.slane %v1529_v8, 2 }
 0x244   : > { %2191 = vperm.xlu0 %3360, %v4406_v27   ;;  %v1825_v26 = vadd.f32 %v1824_v21, %v1823_v47  ;;  %v1817_v0 = vrot.slane %v1816_v40, 1  ;;  %3488 = vrcp.f32 %v1804_v54 }
 0x245   : > { %v3475_v57 = vpop.eup %3474  ;;  %v1782_v13 = vrot.slane %v1781_v45, 1  ;;  %v1830_v14 = vadd.f32 %v1829_v31, %v1828_v17  ;;  %v1531_v62 = vmax.f32 %v1529_v8, %v1530_v25 }
 0x246   : > { %v4420_v7 = vmul.f32 %v3475_v57, %v4270_v63  ;;  %v1843_v63 = vrot.slane %v1842_v56, 2  ;;  %3490 = vrcp.f32 %v1825_v26 }
 0x247   : > { %3353 = vset.pattern.permute.xlu1 %v4870_v51  ;;  %v3477_v37 = vpop.eup %3476  ;;  %v1783_v49 = vadd.f32 %v1782_v13, %v1781_v45  ;;  %v1831_v33 = vrot.slane %v1830_v14, 1  ;;  %v1532_v32 = vrot.slane %v1531_v62, 1 }
 0x248   : > { %1982 = vperm.xlu1 %3353, %v4370_v39   ;;  %2595 = vperm.xlu0 %3360, %v4414_v20   ;;  %v4422_v39 = vpop.eup %3478  ;;  %v1935_v4 = vmul.f32 %v3477_v37, %v4192_v23  ;;  %v1818_v23 = vadd.f32 %v1817_v0, %v1816_v40  ;;  %v1844_v1 = vadd.f32 %v1843_v63, %v1842_v56  ;;  %v4498_v63 = vld [vmem:[%s3719_s12] sm:$0xff] }
 0x249   : > { %v3481_v41 = vpop.eup %3480  ;;  %v1833_v34 = vsel %vm1309_vm2, %v4422_v39, 0.0  ;;  %v1832_v16 = vadd.f32 %v1831_v33, %v1830_v14  ;;  %v1533_v5 = vmax.f32 %v1531_v62, %v1532_v32  ;;  %v3511_v33 = vld [vmem:[%s3719_s12 + $0x18] sm:$0xff] }
 0x24a   : > { %v1834_v44 = vrot.slane %v1833_v34, 4  ;;  %3492 = vrcp.f32 %v1818_v23  ;;  %v1845_v11 = vrot.slane %v1844_v1, 1 }
 0x24b   : > { %v4430_v6 = vpop.eup %3482  ;;  %3494 = vrcp.f32 %v1783_v49  ;;  %v1565_v60 = vsub.f32 %v4395_v18, %v1533_v5 }
 0x24c   : > { %3356 = vset.pattern.permute.xlu1 %v4871_v61  ;;  %3361 = vset.pattern.permute.xlu0 %v4870_v51  ;;  %v3485_v24 = vpop.eup %3484  ;;  %v1805_v46 = vsel %vm1309_vm2, %v4430_v6, 0.0  ;;  %v1835_v43 = vadd.f32 %v1834_v44, %v1833_v34  ;;  %3496 = vrcp.f32 %v1832_v16  ;;  %v1846_v30 = vadd.f32 %v1845_v11, %v1844_v1  ;;  %v3512_v11 = vld [vmem:[%s3719_s12 + $0x10] sm:$0xff] }
 0x24d   : > { %2187 = vperm.xlu1 %3356, %v1932_v2   ;;  %1997 = vperm.xlu0 %3361, %v4420_v7   ;;  %v4433_v2 = vmul.f32 %v3481_v41, %v4301_v42  ;;  %v4441_v42 = vmul.f32 %v3485_v24, %v4336_v12  ;;  %v1806_v22 = vrot.slane %v1805_v46, 4  ;;  %v1628_v36 = vmul.f32 1.442695, %v1565_v60 }
 0x24e   : > { %v3487_v55 = vpop.eup %3486  ;;  %v1836_v58 = vrot.slane %v1835_v43, 2  ;;  %3498 = vrcp.f32 %v1846_v30 }
 0x24f   : > { %v4446_v9 = vmul.f32 %v3487_v55, %v4348_v3  ;;  %v1807_v12 = vadd.f32 %v1806_v22, %v1805_v46  ;;  %3500 = vpow2.f32 %v1628_v36 }
 0x250   : > { %v1837_v3 = vadd.f32 %v1836_v58, %v1835_v43 }
 0x251   : > { %3357 = vset.pattern.permute.xlu1 %v4870_v51  ;;  %3366 = vset.pattern.permute.xlu0 %v4871_v61  ;;  %v3489_v35 = vpop.eup %3488  ;;  %v1808_v28 = vrot.slane %v1807_v12, 2 }
 0x252   : > { %2392 = vperm.xlu1 %3357, %v1935_v4   ;;  %2199 = vperm.xlu0 %3366, %v4433_v2   ;;  %v4453_v47 = vmul.f32 %v3489_v35, %v4359_v52  ;;  %v1838_v17 = vrot.slane %v1837_v3, 1 }
 0x253   : > { %v3491_v15 = vpop.eup %3490  ;;  %v1809_v48 = vadd.f32 %v1808_v28, %v1807_v12 }
 0x255   : > { %v1810_v8 = vrot.slane %v1809_v48, 1 }
 0x256   : > { %3358 = vset.pattern.permute.xlu1 %v4871_v61  ;;  %3367 = vset.pattern.permute.xlu0 %v4870_v51 }
 0x257   : > { %2591 = vperm.xlu1 %3358, %v1935_v4   ;;  %2407 = vperm.xlu0 %3367, %v4441_v42   ;;  %v3493_v18 = vpop.eup %3492  ;;  %v1811_v40 = vadd.f32 %v1810_v8, %v1809_v48 }
 0x258   : > { %v3495_v53 = vpop.eup %3494  ;;  %v4466_v52 = vmul.f32 %v3493_v18, %v4373_v59  ;;  %v3513_v18 = vld [vmem:[%s3719_s12 + $0x28] sm:$0xff] }
 0x259   : > { %v3497_v57 = vpop.eup %3496 }
 0x25a   : > { %v4472_v21 = vmul.f32 %v3497_v57, %v4393_v10 }
 0x25b   : > { %3359 = vset.pattern.permute.xlu1 %v4870_v51  ;;  %2007 = vperm.xlu0 %3367, %v4446_v9   ;;  %v3499_v31 = vpop.eup %3498 }
 0x25c   : > { %1992 = vperm.xlu1 %3359, %v4406_v27   ;;  %v4459_v27 = vmul.f32 %v3491_v15, %v4363_v19  ;;  %v1839_v19 = vadd.f32 %v1838_v17, %v1837_v3  ;;  %v4478_v59 = vpop.eup %3500 }
 0x25d   : > { %v1847_v10 = vsel %vm1309_vm2, %v4478_v59, 0.0 }
 0x25e   : > { %3502 = vrcp.f32 %v1839_v19  ;;  %v1848_v54 = vrot.slane %v1847_v10, 4 }
 0x25f   : > { %3372 = vset.pattern.permute.xlu0 %v4871_v61  ;;  %3504 = vrcp.f32 %v1811_v40 }
 0x260   : > { %2397 = vperm.xlu1 %3359, %v4414_v20   ;;  %2207 = vperm.xlu0 %3372, %v4453_v47   ;;  %v1939_v20 = vmul.f32 %v3495_v53, %v4353_v38  ;;  %v1948_v38 = vmul.f32 %v3499_v31, %v4403_v50  ;;  %v3509_v50 = vld [vmem:[%s3719_s12 + $0x8] sm:$0xff]  ;;  %v1849_v41 = vadd.f32 %v1848_v54, %v1847_v10 }
 0x262   : > { %v1850_v34 = vrot.slane %v1849_v41, 2 }
 0x264   : > { %3362 = vset.pattern.permute.xlu1 %v4871_v61  ;;  %3373 = vset.pattern.permute.xlu0 %v4870_v51  ;;  %v1851_v44 = vadd.f32 %v1850_v34, %v1849_v41 }
 0x265   : > { %2195 = vperm.xlu1 %3362, %v4420_v7   ;;  %2417 = vperm.xlu0 %3373, %v4459_v27  }
 0x269   : > { %3363 = vset.pattern.permute.xlu1 %v4870_v51  ;;  %2017 = vperm.xlu0 %3373, %v4466_v52  }
 0x26a   : > { %2402 = vperm.xlu1 %3363, %v1939_v20  }
 0x26b   : > { %v3503_v37 = vpop.eup %3502 }
 0x26c   : > { %v4491_v26 = vmul.f32 %v3503_v37, %v4422_v39  ;;  %v3505_v0 = vpop.eup %3504 }
 0x26d   : > { %3376 = vset.pattern.permute.xlu0 %v4871_v61 }
 0x26e   : > { %3364 = vset.pattern.permute.xlu1 %v4871_v61  ;;  %2215 = vperm.xlu0 %3376, %v4472_v21  }
 0x26f   : > { %2599 = vperm.xlu1 %3364, %v1939_v20  }
 0x272   : > { %3377 = vset.pattern.permute.xlu0 %v4870_v51 }
 0x273   : > { %3365 = vset.pattern.permute.xlu1 %v4870_v51  ;;  %2027 = vperm.xlu0 %3377, %v1948_v38  }
 0x274   : > { %2002 = vperm.xlu1 %3365, %v4433_v2   ;;  %v1943_v2 = vmul.f32 %v3505_v0, %v4430_v6  ;;  %v1852_v6 = vrot.slane %v1851_v44, 1 }
 0x276   : > { %v2560_v45 = vpop.permute.xlu0 %2559  ;;  %v2353_v25 = vpop.permute.xlu1 %2352  ;;  %v1853_v30 = vadd.f32 %v1852_v6, %v1851_v44 }
 0x277   : > { %3378 = vset.pattern.permute.xlu0 %v4871_v61  ;;  %v2622_v56 = vmul.f32 %v3509_v50, %v2560_v45  ;;  %v2430_v48 = vmul.f32 %v3509_v50, %v2353_v25 }
 0x278   : > { %3368 = vset.pattern.permute.xlu1 %v4871_v61  ;;  %2219 = vperm.xlu0 %3378, %v1948_v38   ;;  %3506 = vrcp.f32 %v1853_v30  ;;  %v4537_v30 = vld [vmem:[%s3719_s12 + $0x30] sm:$0xff] }
 0x279   : > { %2603 = vperm.xlu1 %3368, %v4441_v42   ;;  %v2638_v7 = vsel %vm358_vm0, %v2622_v56, 0.0  ;;  %v2446_v45 = vsel %vm358_vm0, %v2430_v48, 0.0 }
 0x27a   : > { %v2639_v4 = vrot.slane %v2638_v7, 4 }
 0x27c   : > { %2615 = vperm.xlu0 %3378, %v4491_v26   ;;  %v2640_v23 = vadd.f32 %v2639_v4, %v2638_v7  ;;  %v4518_v7 = vld [vmem:[%s3719_s12 + $0x20] sm:$0xff] }
 0x27d   : > { %2203 = vperm.xlu1 %3368, %v4446_v9   ;;  %v4495_v13 = vpop.permute.xlu1 %2159  ;;  %v1953_v14 = vpop.permute.xlu0 %1952 }
 0x27e   : > { %v2030_v62 = vmul.f32 %v4498_v63, %v1953_v14  ;;  %v2641_v1 = vrot.slane %v2640_v23, 2  ;;  %v2222_v34 = vmul.f32 %v4498_v63, %v4495_v13 }
 0x280   : > { %v2046_v39 = vsel %vm358_vm0, %v2030_v62, 0.0  ;;  %v2642_v16 = vadd.f32 %v2641_v1, %v2640_v23 }
 0x281   : > { %3369 = vset.pattern.permute.xlu1 %v4870_v51  ;;  %v2564_v24 = vpop.permute.xlu1 %2563  ;;  %v2047_v49 = vrot.slane %v2046_v39, 4  ;;  %v2358_v32 = vpop.permute.xlu0 %2357 }
 0x282   : > { %2412 = vperm.xlu1 %3369, %v1943_v2   ;;  %v2623_v46 = vmul.f32 %v3511_v33, %v2564_v24  ;;  %v2643_v15 = vrot.slane %v2642_v16, 1  ;;  %v2431_v31 = vmul.f32 %v3511_v33, %v2358_v32 }
 0x283   : > { %v2048_v22 = vadd.f32 %v2047_v49, %v2046_v39  ;;  %v3515_v49 = vld [vmem:[%s3719_s12 + $0x38] sm:$0xff] }
 0x284   : > { %v2645_v42 = vsel %vm358_vm0, %v2623_v46, 0.0  ;;  %v2453_v0 = vsel %vm358_vm0, %v2431_v31, 0.0 }
 0x285   : > { %v2646_v55 = vrot.slane %v2645_v42, 4  ;;  %v2049_v35 = vrot.slane %v2048_v22, 2  ;;  %v2454_v1 = vrot.slane %v2453_v0, 4 }
 0x286   : > { %3370 = vset.pattern.permute.xlu1 %v4871_v61  ;;  %v1958_v43 = vpop.permute.xlu1 %1957  ;;  %v2164_v12 = vpop.permute.xlu0 %2163 }
 0x287   : > { %2607 = vperm.xlu1 %3370, %v1943_v2   ;;  %v2647_v5 = vadd.f32 %v2646_v55, %v2645_v42  ;;  %v2031_v9 = vmul.f32 %v3512_v11, %v1958_v43  ;;  %v2050_v20 = vadd.f32 %v2049_v35, %v2048_v22  ;;  %v2223_v4 = vmul.f32 %v3512_v11, %v2164_v12 }
 0x289   : > { %v2648_v58 = vrot.slane %v2647_v5, 2  ;;  %v2053_v60 = vsel %vm358_vm0, %v2031_v9, 0.0  ;;  %v2051_v56 = vrot.slane %v2050_v20, 1 }
 0x28a   : > { %v2054_v36 = vrot.slane %v2053_v60, 4 }
 0x28b   : > { %3371 = vset.pattern.permute.xlu1 %v4870_v51  ;;  %v2649_v28 = vadd.f32 %v2648_v58, %v2647_v5  ;;  %v2568_v3 = vpop.permute.xlu1 %2567  ;;  %v2363_v57 = vpop.permute.xlu0 %2362  ;;  %v2052_v32 = vadd.f32 %v2051_v56, %v2050_v20  ;;  %v2455_v58 = vadd.f32 %v2454_v1, %v2453_v0 }
 0x28c   : > { %2012 = vperm.xlu1 %3371, %v4453_v47   ;;  %v2624_v17 = vmul.f32 %v3513_v18, %v2568_v3  ;;  %v2055_v19 = vadd.f32 %v2054_v36, %v2053_v60  ;;  %v2644_v47 = vadd.f32 %v2643_v15, %v2642_v16  ;;  %v2432_v24 = vmul.f32 %v3513_v18, %v2363_v57 }
 0x28d   : > { %v2650_v53 = vrot.slane %v2649_v28, 1  ;;  %v2238_v16 = vsel %vm358_vm0, %v2222_v34, 0.0  ;;  %v2456_v57 = vrot.slane %v2455_v58, 2 }
 0x28e   : > { %v2652_v8 = vsel %vm358_vm0, %v2624_v17, 0.0  ;;  %v2056_v10 = vrot.slane %v2055_v19, 2  ;;  %v2460_v11 = vsel %vm358_vm0, %v2432_v24, 0.0 }
 0x28f   : > { %v2651_v40 = vadd.f32 %v2650_v53, %v2649_v28  ;;  %v2653_v38 = vrot.slane %v2652_v8, 4  ;;  %v3507_v28 = vpop.eup %3506  ;;  %v2239_v53 = vrot.slane %v2238_v16, 4 }
 0x290   : > { %3374 = vset.pattern.permute.xlu1 %v4871_v61  ;;  %v1963_v54 = vpop.permute.xlu1 %1962  ;;  %v2057_v25 = vadd.f32 %v2056_v10, %v2055_v19  ;;  %v1949_v31 = vmul.f32 %v3507_v28, %v4478_v59  ;;  %v3519_v28 = vld [vmem:[%s3719_s12 + $0x40] sm:$0xff] }
 0x291   : > { %2611 = vperm.xlu1 %3374, %v4459_v27   ;;  %v2877_v37 = vsel %vm2766_vm3, %v2651_v40, %v2644_v47  ;;  %v2654_v50 = vadd.f32 %v2653_v38, %v2652_v8  ;;  %v2032_v41 = vmul.f32 %v4518_v7, %v1963_v54  ;;  %v2447_v27 = vrot.slane %v2446_v45, 4 }
 0x292   : > { %v2058_v62 = vrot.slane %v2057_v25, 1 }
 0x293   : > { %v2655_v14 = vrot.slane %v2654_v50, 2  ;;  %v2060_v2 = vsel %vm358_vm0, %v2032_v41, 0.0  ;;  %v2572_v23 = vpop.permute.xlu0 %2571  ;;  %v2448_v63 = vadd.f32 %v2447_v27, %v2446_v45  ;;  %v2457_v41 = vadd.f32 %v2456_v57, %v2455_v58 }
 0x294   : > { %v2061_v44 = vrot.slane %v2060_v2, 4  ;;  %v2625_v33 = vmul.f32 %v3515_v49, %v2572_v23  ;;  %v2059_v42 = vadd.f32 %v2058_v62, %v2057_v25 }
 0x295   : > { %2211 = vperm.xlu1 %3374, %v4466_v52   ;;  %v2656_v39 = vadd.f32 %v2655_v14, %v2654_v50  ;;  %v4527_v46 = vpop.permute.xlu1 %2167  ;;  %v2245_v52 = vsel %vm358_vm0, %v2223_v4, 0.0  ;;  %v2449_v48 = vrot.slane %v2448_v63, 2 }
 0x296   : > { %v2062_v6 = vadd.f32 %v2061_v44, %v2060_v2  ;;  %v2659_v13 = vsel %vm358_vm0, %v2625_v33, 0.0  ;;  %v2767_v22 = vsel %vm2766_vm3, %v2059_v42, %v2052_v32  ;;  %v2246_v35 = vrot.slane %v2245_v52, 4  ;;  %v3517_v2 = vld [vmem:[%s3719_s12 + $0x48] sm:$0xff] }
 0x297   : > { %v2657_v55 = vrot.slane %v2656_v39, 1  ;;  %v2660_v43 = vrot.slane %v2659_v13, 4  ;;  %v2450_v50 = vadd.f32 %v2449_v48, %v2448_v63  ;;  %v2458_v32 = vrot.slane %v2457_v41, 1 }
 0x298   : > { %v2063_v9 = vrot.slane %v2062_v6, 2  ;;  %v1968_v12 = vpop.permute.xlu0 %1967  ;;  %v2247_v47 = vadd.f32 %v2246_v35, %v2245_v52 }
 0x299   : > { %3375 = vset.pattern.permute.xlu1 %v4870_v51  ;;  %v2658_v5 = vadd.f32 %v2657_v55, %v2656_v39  ;;  %v2661_v60 = vadd.f32 %v2660_v43, %v2659_v13  ;;  %v2033_v51 = vmul.f32 %v4537_v30, %v1968_v12  ;;  %v2451_v24 = vrot.slane %v2450_v50, 1 }
 0x29a   : > { %2422 = vperm.xlu1 %3375, %v4491_v26   ;;  %v2368_v15 = vpop.permute.xlu1 %2367  ;;  %v2064_v36 = vadd.f32 %v2063_v9, %v2062_v6  ;;  %v2461_v26 = vrot.slane %v2460_v11, 4  ;;  %v2248_v0 = vrot.slane %v2247_v47, 2  ;;  %v3518_v6 = vld [vmem:[%s3719_s12 + $0x58] sm:$0xff]  ;;  %v2224_v43 = vmul.f32 %v4518_v7, %v4527_v46 }
 0x29b   : > { %v2878_v3 = vsel %vm2768_vm4, %v2658_v5, %v2877_v37  ;;  %v2662_v18 = vrot.slane %v2661_v60, 2  ;;  %v2067_v17 = vsel %vm358_vm0, %v2033_v51, 0.0  ;;  %v2433_v59 = vmul.f32 %v3515_v49, %v2368_v15 }
 0x29c   : > { %v2065_v20 = vrot.slane %v2064_v36, 1  ;;  %v2068_v19 = vrot.slane %v2067_v17, 4  ;;  %v2462_v45 = vadd.f32 %v2461_v26, %v2460_v11  ;;  %v4553_v1 = vadd.f32 %v2248_v0, %v2247_v47 }
 0x29d   : > { %v2373_v8 = vpop.permute.xlu0 %2372  ;;  %v2663_v40 = vadd.f32 %v2662_v18, %v2661_v60  ;;  %v2459_v58 = vadd.f32 %v2458_v32, %v2457_v41  ;;  %v2252_v26 = vsel %vm358_vm0, %v2224_v43, 0.0 }
 0x29e   : > { %2022 = vperm.xlu1 %3375, %v4472_v21   ;;  %v2066_v38 = vadd.f32 %v2065_v20, %v2064_v36  ;;  %v2069_v10 = vadd.f32 %v2068_v19, %v2067_v17  ;;  %v2240_v21 = vadd.f32 %v2239_v53, %v2238_v16  ;;  %v2463_v62 = vrot.slane %v2462_v45, 2  ;;  %v3520_v17 = vld [vmem:[%s3719_s12 + $0x50] sm:$0xff] }
 0x29f   : > { %v2172_v54 = vpop.permute.xlu1 %2171  ;;  %v2664_v37 = vrot.slane %v2663_v40, 1  ;;  %v2434_v42 = vmul.f32 %v3517_v2, %v2373_v8  ;;  %v2250_v51 = vrot.slane %v4553_v1, 1 }
 0x2a0   : > { %v2769_v56 = vsel %vm2768_vm4, %v2066_v38, %v2767_v22  ;;  %v2070_v25 = vrot.slane %v2069_v10, 2  ;;  %v2241_v44 = vrot.slane %v2240_v21, 2  ;;  %v2464_v22 = vadd.f32 %v2463_v62, %v2462_v45 }
 0x2a1   : > { %v2665_v4 = vadd.f32 %v2664_v37, %v2663_v40  ;;  %v2474_v7 = vsel %vm358_vm0, %v2434_v42, 0.0  ;;  %v2225_v20 = vmul.f32 %v4537_v30, %v2172_v54 }
 0x2a2   : > { %2427 = vperm.xlu1 %3375, %v1949_v31   ;;  %v4545_v14 = vpop.permute.xlu0 %2175  ;;  %v2071_v27 = vadd.f32 %v2070_v25, %v2069_v10  ;;  %v4564_v12 = vadd.f32 %v2241_v44, %v2240_v21  ;;  %v2465_v36 = vrot.slane %v2464_v22, 1  ;;  %v2475_v47 = vrot.slane %v2474_v7, 4 }
 0x2a3   : > { %v2576_v34 = vpop.permute.xlu1 %2575  ;;  %v4550_v39 = vsel %vm2770_vm5, %v2665_v4, %v2878_v3  ;;  %v2259_v30 = vsel %vm358_vm0, %v2225_v20, 0.0 }
 0x2a4   : > { %v2626_v23 = vmul.f32 %v3517_v2, %v2576_v34  ;;  %v2072_v33 = vrot.slane %v2071_v27, 1  ;;  %v2466_v21 = vadd.f32 %v2465_v36, %v2464_v22  ;;  %v2476_v34 = vadd.f32 %v2475_v47, %v2474_v7  ;;  %v3523_v36 = vld [vmem:[%s3719_s12 + $0x60] sm:$0xff] }
 0x2a5   : > { %v2226_v2 = vmul.f32 %v3519_v28, %v4545_v14  ;;  %v2243_v42 = vrot.slane %v4564_v12, 1  ;;  %v4582_v14 = vadd.f32 %v2250_v51, %v4553_v1  ;;  %v3522_v51 = vld [vmem:[%s3719_s12 + $0x68] sm:$0xff] }
 0x2a6   : > { %3379 = vset.pattern.permute.xlu1 %v4871_v61  ;;  %v2580_v49 = vpop.permute.xlu0 %2579  ;;  %v2666_v52 = vsel %vm358_vm0, %v2626_v23, 0.0  ;;  %v2073_v55 = vadd.f32 %v2072_v33, %v2071_v27  ;;  %v2467_v61 = vsel %vm358_vm0, %v2433_v59, 0.0  ;;  %v2477_v43 = vrot.slane %v2476_v34, 2 }
 0x2a7   : > { %2587 = vperm.xlu1 %3379, %v4384_v29   ;;  %v2627_v13 = vmul.f32 %v3518_v6, %v2580_v49  ;;  %v2667_v63 = vrot.slane %v2666_v52, 4  ;;  %v2452_v29 = vadd.f32 %v2451_v24, %v2450_v50  ;;  %v2468_v35 = vrot.slane %v2467_v61, 4 }
 0x2a8   : > { %v1973_v16 = vpop.permute.xlu1 %1972  ;;  %v4561_v5 = vsel %vm2770_vm5, %v2073_v55, %v2769_v56  ;;  %v2253_v56 = vrot.slane %v2252_v26, 4 }
 0x2a9   : > { %v2673_v11 = vsel %vm358_vm0, %v2627_v13, 0.0  ;;  %v2668_v9 = vadd.f32 %v2667_v63, %v2666_v52  ;;  %v2034_v3 = vmul.f32 %v3519_v28, %v1973_v16  ;;  %v2469_v40 = vadd.f32 %v2468_v35, %v2467_v61 }
 0x2aa   : > { %v2674_v60 = vrot.slane %v2673_v11, 4  ;;  %v2841_v49 = vsel %vm2766_vm3, %v2459_v58, %v2452_v29  ;;  %v2254_v52 = vadd.f32 %v2253_v56, %v2252_v26  ;;  %v2260_v61 = vrot.slane %v2259_v30, 4 }
 0x2ab   : > { %2619 = vperm.xlu1 %3379, %v1949_v31   ;;  %v2669_v46 = vrot.slane %v2668_v9, 2  ;;  %v1978_v15 = vpop.permute.xlu0 %1977  ;;  %v2074_v8 = vsel %vm358_vm0, %v2034_v3, 0.0  ;;  %v2470_v62 = vrot.slane %v2469_v40, 2  ;;  %v4585_v22 = vsel %vm2768_vm4, %v2466_v21, %v2841_v49 }
 0x2ac   : > { %v2675_v18 = vadd.f32 %v2674_v60, %v2673_v11  ;;  %v2035_v48 = vmul.f32 %v3520_v17, %v1978_v15  ;;  %v2378_v53 = vpop.permute.xlu1 %2377  ;;  %v2075_v37 = vrot.slane %v2074_v8, 4  ;;  %v2266_v11 = vsel %vm358_vm0, %v2226_v2, 0.0 }
 0x2ad   : > { %v2670_v19 = vadd.f32 %v2669_v46, %v2668_v9  ;;  %v2435_v57 = vmul.f32 %v3518_v6, %v2378_v53  ;;  %v2471_v29 = vadd.f32 %v2470_v62, %v2469_v40  ;;  %v2255_v60 = vrot.slane %v2254_v52, 2  ;;  %v4592_v46 = vld [vmem:[%s3719_s12 + $0x78] sm:$0xff]  ;;  %v3524_v40 = vld [vmem:[%s3719_s12 + $0x70] sm:$0xff] }
 0x2ae   : > { %v2676_v31 = vrot.slane %v2675_v18, 2  ;;  %v2081_v38 = vsel %vm358_vm0, %v2035_v48, 0.0  ;;  %v2076_v4 = vadd.f32 %v2075_v37, %v2074_v8  ;;  %v2261_v28 = vadd.f32 %v2260_v61, %v2259_v30 }
 0x2af   : > { %v2671_v10 = vrot.slane %v2670_v19, 1  ;;  %v2082_v45 = vrot.slane %v2081_v38, 4  ;;  %v2481_v50 = vsel %vm358_vm0, %v2435_v57, 0.0  ;;  %v2267_v48 = vrot.slane %v2266_v11, 4 }
 0x2b0   : > { %v2677_v25 = vadd.f32 %v2676_v31, %v2675_v18  ;;  %v2482_v41 = vrot.slane %v2481_v50, 4  ;;  %v2077_v44 = vrot.slane %v2076_v4, 2  ;;  %v2472_v8 = vrot.slane %v2471_v29, 1 }
 0x2b1   : > { %v2672_v54 = vadd.f32 %v2671_v10, %v2670_v19  ;;  %v2083_v0 = vadd.f32 %v2082_v45, %v2081_v38  ;;  %v2184_v27 = vpop.permute.xlu0 %2183  ;;  %v2180_v59 = vpop.permute.xlu1 %2179  ;;  %v2262_v21 = vrot.slane %v2261_v28, 2 }
 0x2b2   : > { %v2678_v23 = vrot.slane %v2677_v25, 1  ;;  %v2483_v33 = vadd.f32 %v2482_v41, %v2481_v50  ;;  %v2078_v13 = vadd.f32 %v2077_v44, %v2076_v4  ;;  %v2227_v63 = vmul.f32 %v3520_v17, %v2180_v59 }
 0x2b3   : > { %v2084_v24 = vrot.slane %v2083_v0, 2  ;;  %v2880_v32 = vsel %vm2772_vm6, %v2672_v54, %v4550_v39  ;;  %v2228_v26 = vmul.f32 %v3523_v36, %v2184_v27  ;;  %v2478_v17 = vadd.f32 %v2477_v43, %v2476_v34 }
 0x2b4   : > { %v2679_v55 = vadd.f32 %v2678_v23, %v2677_v25  ;;  %v2079_v9 = vrot.slane %v2078_v13, 1  ;;  %v2484_v58 = vrot.slane %v2483_v33, 2  ;;  %v2273_v18 = vsel %vm358_vm0, %v2227_v63, 0.0 }
 0x2b5   : > { %v2085_v6 = vadd.f32 %v2084_v24, %v2083_v0  ;;  %v2274_v10 = vrot.slane %v2273_v18, 4  ;;  %v2280_v56 = vsel %vm358_vm0, %v2228_v26, 0.0  ;;  %v2479_v27 = vrot.slane %v2478_v17, 1 }
 0x2b6   : > { %v2388_v39 = vpop.permute.xlu0 %2387  ;;  %v4588_v16 = vsel %vm2774_vm7, %v2679_v55, %v2880_v32  ;;  %v2080_v3 = vadd.f32 %v2079_v9, %v2078_v13  ;;  %v2485_v57 = vadd.f32 %v2484_v58, %v2483_v33  ;;  %v2473_v59 = vadd.f32 %v2472_v8, %v2471_v29 }
 0x2b7   : > { %v2086_v7 = vrot.slane %v2085_v6, 1  ;;  %v2437_v1 = vmul.f32 %v4592_v46, %v2388_v39  ;;  %v2275_v23 = vadd.f32 %v2274_v10, %v2273_v18  ;;  %v2268_v33 = vadd.f32 %v2267_v48, %v2266_v11 }
 0x2b8   : > { %v2773_v50 = vsel %vm2772_vm6, %v2080_v3, %v4561_v5  ;;  %v2486_v34 = vrot.slane %v2485_v57, 1  ;;  %v2256_v5 = vadd.f32 %v2255_v60, %v2254_v52  ;;  %v2281_v32 = vrot.slane %v2280_v56, 4 }
 0x2b9   : > { %v2383_v35 = vpop.permute.xlu1 %2382  ;;  %v2495_v53 = vsel %vm358_vm0, %v2437_v1, 0.0  ;;  %v2087_v38 = vadd.f32 %v2086_v7, %v2085_v6  ;;  %v2263_v6 = vadd.f32 %v2262_v21, %v2261_v28  ;;  %v2480_v39 = vadd.f32 %v2479_v27, %v2478_v17  ;;  %v4620_v21 = vld [vmem:[%s3719_s12 + $0x90] sm:$0xff] }
 0x2ba   : > { %v2436_v15 = vmul.f32 %v3522_v51, %v2383_v35  ;;  %v1988_v20 = vpop.permute.xlu0 %1987  ;;  %v2496_v47 = vrot.slane %v2495_v53, 4  ;;  %v2487_v29 = vadd.f32 %v2486_v34, %v2485_v57  ;;  %v2843_v52 = vsel %vm2770_vm5, %v2473_v59, %v4585_v22 }
 0x2bb   : > { %v2037_v31 = vmul.f32 %v3524_v40, %v1988_v20  ;;  %v4606_v4 = vsel %vm2774_vm7, %v2087_v38, %v2773_v50  ;;  %v2276_v35 = vrot.slane %v2275_v23, 2  ;;  %v2269_v1 = vrot.slane %v2268_v33, 2 }
 0x2bc   : > { %v2488_v19 = vsel %vm358_vm0, %v2436_v15, 0.0  ;;  %v2497_v25 = vadd.f32 %v2496_v47, %v2495_v53  ;;  %v2257_v3 = vrot.slane %v2256_v5, 1  ;;  %v2844_v17 = vsel %vm2772_vm6, %v2480_v39, %v2843_v52 }
 0x2bd   : > { %v2489_v45 = vrot.slane %v2488_v19, 4  ;;  %v2095_v41 = vsel %vm358_vm0, %v2037_v31, 0.0  ;;  %v2264_v48 = vrot.slane %v2263_v6, 1  ;;  %v2845_v22 = vsel %vm2774_vm7, %v2487_v29, %v2844_v17 }
 0x2be   : > { %v2584_v37 = vpop.permute.xlu1 %2583  ;;  %v2096_v30 = vrot.slane %v2095_v41, 4  ;;  %v2498_v62 = vrot.slane %v2497_v25, 2  ;;  %v2270_v38 = vadd.f32 %v2269_v1, %v2268_v33 }
 0x2bf   : > { %v2490_v54 = vadd.f32 %v2489_v45, %v2488_v19  ;;  %v2628_v0 = vmul.f32 %v3522_v51, %v2584_v37  ;;  %v4608_v2 = vpop.permute.xlu0 %2191  ;;  %v2282_v51 = vadd.f32 %v2281_v32, %v2280_v56  ;;  %v2277_v19 = vadd.f32 %v2276_v35, %v2275_v23 }
 0x2c0   : > { %v2499_v49 = vadd.f32 %v2498_v62, %v2497_v25  ;;  %v2097_v13 = vadd.f32 %v2096_v30, %v2095_v41  ;;  %v2258_v30 = vadd.f32 %v2257_v3, %v2256_v5  ;;  %v2265_v59 = vadd.f32 %v2264_v48, %v2263_v6 }
 0x2c1   : > { %v2491_v24 = vrot.slane %v2490_v54, 2  ;;  %v2680_v44 = vsel %vm358_vm0, %v2628_v0, 0.0  ;;  %v2283_v10 = vrot.slane %v2282_v51, 2  ;;  %v2278_v34 = vrot.slane %v2277_v19, 1 }
 0x2c2   : > { %v2681_v55 = vrot.slane %v2680_v44, 4  ;;  %v2500_v60 = vrot.slane %v2499_v49, 1  ;;  %v2098_v26 = vrot.slane %v2097_v13, 2 }
 0x2c3   : > { %v1983_v61 = vpop.permute.xlu1 %1982  ;;  %v2492_v63 = vadd.f32 %v2491_v24, %v2490_v54  ;;  %v4611_v58 = vpop.permute.xlu0 %2595  ;;  %v2271_v24 = vrot.slane %v2270_v38, 1  ;;  %v2279_v6 = vadd.f32 %v2278_v34, %v2277_v19  ;;  %v3529_v34 = vld [vmem:[%s3719_s12 + $0x88] sm:$0xff] }
 0x2c4   : > { %v2036_v43 = vmul.f32 %v3523_v36, %v1983_v61  ;;  %v2682_v9 = vadd.f32 %v2681_v55, %v2680_v44  ;;  %v2501_v47 = vadd.f32 %v2500_v60, %v2499_v49  ;;  %v2099_v50 = vadd.f32 %v2098_v26, %v2097_v13 }
 0x2c5   : > { %v2493_v7 = vrot.slane %v2492_v63, 1  ;;  %v2284_v44 = vadd.f32 %v2283_v10, %v2282_v51  ;;  %v2272_v39 = vadd.f32 %v2271_v24, %v2270_v38 }
 0x2c6   : > { %v2088_v11 = vsel %vm358_vm0, %v2036_v43, 0.0  ;;  %v2683_v15 = vrot.slane %v2682_v9, 2 }
 0x2c7   : > { %v2089_v28 = vrot.slane %v2088_v11, 4  ;;  %v2494_v36 = vadd.f32 %v2493_v7, %v2492_v63  ;;  %v2285_v29 = vrot.slane %v2284_v44, 1 }
 0x2c8   : > { %v2188_v18 = vpop.permute.xlu1 %2187  ;;  %v2684_v53 = vadd.f32 %v2683_v15, %v2682_v9  ;;  %v1998_v8 = vpop.permute.xlu0 %1997 }
 0x2c9   : > { %v2090_v20 = vadd.f32 %v2089_v28, %v2088_v11  ;;  %v2229_v57 = vmul.f32 %v3524_v40, %v2188_v18  ;;  %v2846_v31 = vsel %vm2776_vm8, %v2494_v36, %v2845_v22  ;;  %v2039_v56 = vmul.f32 %v4620_v21, %v1998_v8  ;;  %v3526_v28 = vld [vmem:[%s3719_s12 + $0x80] sm:$0xff] }
 0x2ca   : > { %v2685_v45 = vrot.slane %v2684_v53, 1  ;;  %v2847_v41 = vsel %vm2778_vm9, %v2501_v47, %v2846_v31  ;;  %v2244_v40 = vadd.f32 %v2243_v42, %v4564_v12  ;;  %v2100_v12 = vrot.slane %v2099_v50, 1 }
 0x2cb   : > { %v2091_v37 = vrot.slane %v2090_v20, 2  ;;  %v2287_v25 = vsel %vm358_vm0, %v2229_v57, 0.0  ;;  %2855 = vrot.lane.b32.xlu0 %v2847_v41, %s3605_s20  ;;  %v2109_v62 = vsel %vm358_vm0, %v2039_v56, 0.0  ;;  %v2286_v51 = vadd.f32 %v2285_v29, %v2284_v44 }
 0x2cc   : > { %v2686_v54 = vadd.f32 %v2685_v45, %v2684_v53  ;;  %v2288_v23 = vrot.slane %v2287_v25, 4  ;;  %v2805_v32 = vsel %vm2766_vm3, %v4582_v14, %v2244_v40  ;;  %v2110_v61 = vrot.slane %v2109_v62, 4  ;;  %v3528_v40 = vld [vmem:[%s3719_s12 + $0x98] sm:$0xff] }
 0x2cd   : > { %v2092_v0 = vadd.f32 %v2091_v37, %v2090_v20  ;;  %v4629_v27 = vpop.permute.xlu1 %2392  ;;  %v2806_v49 = vsel %vm2768_vm4, %v2258_v30, %v2805_v32  ;;  %v2101_v14 = vadd.f32 %v2100_v12, %v2099_v50  ;;  %v2200_v7 = vpop.permute.xlu0 %2199  ;;  %v2230_v45 = vmul.f32 %v3526_v28, %v4608_v2  ;;  %v4656_v50 = vld [vmem:[%s3719_s12 + $0xb0] sm:$0xff] }
 0x2ce   : > { %v2289_v42 = vadd.f32 %v2288_v23, %v2287_v25  ;;  %v4636_v5 = vsel %vm2776_vm8, %v2686_v54, %v4588_v16  ;;  %v2807_v43 = vsel %vm2770_vm5, %v2265_v59, %v2806_v49  ;;  %v2111_v16 = vadd.f32 %v2110_v61, %v2109_v62 }
 0x2cf   : > { %v2093_v33 = vrot.slane %v2092_v0, 1  ;;  %v2808_v35 = vsel %vm2772_vm6, %v2272_v39, %v2807_v43  ;;  %v2631_v30 = vmul.f32 %v3528_v40, %v4611_v58  ;;  %v2438_v62 = vmul.f32 %v3529_v34, %v4629_v27 }
 0x2d0   : > { %v2290_v13 = vrot.slane %v2289_v42, 2  ;;  %v2809_v11 = vsel %vm2774_vm7, %v2279_v6, %v2808_v35  ;;  %v2112_v36 = vrot.slane %v2111_v16, 2 }
 0x2d1   : > { %v2094_v55 = vadd.f32 %v2093_v33, %v2092_v0  ;;  %v2810_v18 = vsel %vm2776_vm8, %v2286_v51, %v2809_v11  ;;  %v2294_v0 = vsel %vm358_vm0, %v2230_v45, 0.0  ;;  %v2701_v44 = vsel %vm358_vm0, %v2631_v30, 0.0  ;;  %v3530_v33 = vld [vmem:[%s3719_s12 + $0xa0] sm:$0xff] }
 0x2d2   : > { %v4639_v63 = vpop.permute.xlu1 %2591  ;;  %v2291_v9 = vadd.f32 %v2290_v13, %v2289_v42  ;;  %v2408_v20 = vpop.permute.xlu0 %2407  ;;  %v2113_v22 = vadd.f32 %v2112_v36, %v2111_v16  ;;  %v2295_v24 = vrot.slane %v2294_v0, 4  ;;  %v2232_v32 = vmul.f32 %v3530_v33, %v2200_v7  ;;  %v4675_v13 = vld [vmem:[%s3719_s12 + $0xb8] sm:$0xff]  ;;  %v4681_v16 = vld [vmem:[%s3719_s12 + $0xc0] sm:$0xff] }
 0x2d3   : > { %v2777_v52 = vsel %vm2776_vm8, %v2094_v55, %v4606_v4  ;;  %v2702_v12 = vrot.slane %v2701_v44, 4  ;;  %v2502_v42 = vsel %vm358_vm0, %v2438_v62, 0.0  ;;  %v2441_v27 = vmul.f32 %v4675_v13, %v2408_v20 }
 0x2d4   : > { %v2292_v60 = vrot.slane %v2291_v9, 1  ;;  %v4647_v1 = vsel %vm2778_vm9, %v2101_v14, %v2777_v52  ;;  %v2114_v47 = vrot.slane %v2113_v22, 1  ;;  %v2296_v61 = vadd.f32 %v2295_v24, %v2294_v0 }
 0x2d5   : > { %v2308_v6 = vsel %vm358_vm0, %v2232_v32, 0.0  ;;  %v2630_v39 = vmul.f32 %v3529_v34, %v4639_v63  ;;  %v2503_v52 = vrot.slane %v2502_v42, 4  ;;  %v4688_v63 = vld [vmem:[%s3719_s12 + $0xd8] sm:$0xff] }
 0x2d6   : > { %v2293_v26 = vadd.f32 %v2292_v60, %v2291_v9  ;;  %v2008_v38 = vpop.permute.xlu0 %2007  ;;  %v2115_v37 = vadd.f32 %v2114_v47, %v2113_v22  ;;  %v2703_v60 = vadd.f32 %v2702_v12, %v2701_v44  ;;  %v2309_v7 = vrot.slane %v2308_v6, 4  ;;  %v3534_v22 = vld [vmem:[%s3719_s12 + $0xa8] sm:$0xff] }
 0x2d7   : > { %v1993_v15 = vpop.permute.xlu1 %1992  ;;  %v2041_v56 = vmul.f32 %v4656_v50, %v2008_v38 }
 0x2d8   : > { %v2038_v3 = vmul.f32 %v3526_v28, %v1993_v15  ;;  %v2811_v17 = vsel %vm2778_vm9, %v2293_v26, %v2810_v18  ;;  %v2297_v15 = vrot.slane %v2296_v61, 2  ;;  %v2523_v28 = vsel %vm358_vm0, %v2441_v27, 0.0 }
 0x2d9   : > { %2819 = vrot.lane.b32.xlu0 %v2811_v17, %s3606_s26  ;;  %v2123_v2 = vsel %vm358_vm0, %v2041_v56, 0.0  ;;  %v2524_v47 = vrot.slane %v2523_v28, 4 }
 0x2da   : > { %v2102_v4 = vsel %vm358_vm0, %v2038_v3, 0.0  ;;  %v2124_v58 = vrot.slane %v2123_v2, 4  ;;  %v2694_v3 = vsel %vm358_vm0, %v2630_v39, 0.0 }
 0x2db   : > { %v2103_v48 = vrot.slane %v2102_v4, 4  ;;  %v2398_v53 = vpop.permute.xlu1 %2397  ;;  %v2208_v59 = vpop.permute.xlu0 %2207  ;;  %v2695_v38 = vrot.slane %v2694_v3, 4  ;;  %v2525_v32 = vadd.f32 %v2524_v47, %v2523_v28 }
 0x2dc   : > { %v2439_v49 = vmul.f32 %v3528_v40, %v2398_v53  ;;  %v2125_v29 = vadd.f32 %v2124_v58, %v2123_v2  ;;  %v2234_v35 = vmul.f32 %v4681_v16, %v2208_v59  ;;  %v2298_v59 = vadd.f32 %v2297_v15, %v2296_v61 }
 0x2dd   : > { %v2104_v19 = vadd.f32 %v2103_v48, %v2102_v4  ;;  %v2504_v48 = vadd.f32 %v2503_v52, %v2502_v42  ;;  %v2696_v58 = vadd.f32 %v2695_v38, %v2694_v3 }
 0x2de   : > { %v2509_v11 = vsel %vm358_vm0, %v2439_v49, 0.0  ;;  %v2126_v26 = vrot.slane %v2125_v29, 2  ;;  %v2322_v53 = vsel %vm358_vm0, %v2234_v35, 0.0 }
 0x2df   : > { %v2105_v8 = vrot.slane %v2104_v19, 2  ;;  %v2510_v20 = vrot.slane %v2509_v11, 4  ;;  %v2323_v40 = vrot.slane %v2322_v53, 4  ;;  %v2505_v2 = vrot.slane %v2504_v48, 2 }
 0x2e0   : > { %v2196_v57 = vpop.permute.xlu1 %2195  ;;  %v2418_v55 = vpop.permute.xlu0 %2417 }
 0x2e1   : > { %v2106_v31 = vadd.f32 %v2105_v8, %v2104_v19  ;;  %v2231_v14 = vmul.f32 %v4620_v21, %v2196_v57  ;;  %v2443_v21 = vmul.f32 %v4688_v63, %v2418_v55  ;;  %v2704_v8 = vrot.slane %v2703_v60, 2 }
 0x2e2   : > { %v2310_v57 = vadd.f32 %v2309_v7, %v2308_v6  ;;  %v2511_v34 = vadd.f32 %v2510_v20, %v2509_v11  ;;  %v2324_v55 = vadd.f32 %v2323_v40, %v2322_v53  ;;  %v2506_v39 = vadd.f32 %v2505_v2, %v2504_v48 }
 0x2e3   : > { %v2107_v10 = vrot.slane %v2106_v31, 1  ;;  %v2301_v36 = vsel %vm358_vm0, %v2231_v14, 0.0  ;;  %v2705_v62 = vadd.f32 %v2704_v8, %v2703_v60  ;;  %v2526_v11 = vrot.slane %v2525_v32, 2 }
 0x2e4   : > { %v2018_v18 = vpop.permute.xlu0 %2017  ;;  %v2302_v45 = vrot.slane %v2301_v36, 4  ;;  %v2311_v24 = vrot.slane %v2310_v57, 2  ;;  %v2512_v61 = vrot.slane %v2511_v34, 2 }
 0x2e5   : > { %v2108_v25 = vadd.f32 %v2107_v10, %v2106_v31  ;;  %v2403_v41 = vpop.permute.xlu1 %2402  ;;  %v2537_v10 = vsel %vm358_vm0, %v2443_v21, 0.0  ;;  %v2325_v21 = vrot.slane %v2324_v55, 2 }
 0x2e6   : > { %v2440_v19 = vmul.f32 %v3534_v22, %v2403_v41  ;;  %v2538_v44 = vrot.slane %v2537_v10, 4  ;;  %v2303_v12 = vadd.f32 %v2302_v45, %v2301_v36  ;;  %v2312_v7 = vadd.f32 %v2311_v24, %v2310_v57 }
 0x2e7   : > { %v4662_v54 = vsel %vm2766_vm3, %v2115_v37, %v2108_v25  ;;  %v4699_v37 = vld [vmem:[%s3719_s12 + $0xd0] sm:$0xff]  ;;  %v2127_v25 = vadd.f32 %v2126_v26, %v2125_v29  ;;  %v2507_v36 = vrot.slane %v2506_v39, 1 }
 0x2e8   : > { %v2043_v56 = vmul.f32 %v4699_v37, %v2018_v18  ;;  %v2516_v41 = vsel %vm358_vm0, %v2440_v19, 0.0  ;;  %v2539_v52 = vadd.f32 %v2538_v44, %v2537_v10  ;;  %v2304_v15 = vrot.slane %v2303_v12, 2  ;;  %v3537_v44 = vld [vmem:[%s3719_s12 + $0xf0] sm:$0xff] }
 0x2e9   : > { %v2128_v49 = vrot.slane %v2127_v25, 1  ;;  %v2517_v6 = vrot.slane %v2516_v41, 4  ;;  %v2216_v29 = vpop.permute.xlu0 %2215  ;;  %v2513_v18 = vadd.f32 %v2512_v61, %v2511_v34  ;;  %v2313_v47 = vrot.slane %v2312_v7, 1 }
 0x2ea   : > { %v4668_v23 = vpop.permute.xlu1 %2599  ;;  %v2137_v42 = vsel %vm358_vm0, %v2043_v56, 0.0  ;;  %v2540_v53 = vrot.slane %v2539_v52, 2 }
 0x2eb   : > { %v2138_v35 = vrot.slane %v2137_v42, 4  ;;  %v2129_v28 = vadd.f32 %v2128_v49, %v2127_v25  ;;  %v2518_v3 = vadd.f32 %v2517_v6, %v2516_v41  ;;  %v2632_v19 = vmul.f32 %v3534_v22, %v4668_v23 }
 0x2ec   : > { %v2326_v25 = vadd.f32 %v2325_v21, %v2324_v55  ;;  %v2514_v2 = vrot.slane %v2513_v18, 1  ;;  %v2541_v34 = vadd.f32 %v2540_v53, %v2539_v52 }
 0x2ed   : > { %v2139_v20 = vadd.f32 %v2138_v35, %v2137_v42  ;;  %v2519_v40 = vrot.slane %v2518_v3, 2  ;;  %v2708_v24 = vsel %vm358_vm0, %v2632_v19, 0.0 }
 0x2ee   : > { %v2028_v10 = vpop.permute.xlu0 %2027  ;;  %v2327_v42 = vrot.slane %v2326_v25, 1  ;;  %v2542_v61 = vrot.slane %v2541_v34, 1 }
 0x2ef   : > { %v2003_v43 = vpop.permute.xlu1 %2002  ;;  %v2140_v41 = vrot.slane %v2139_v20, 2  ;;  %v2520_v49 = vadd.f32 %v2519_v40, %v2518_v3 }
 0x2f0   : > { %v2040_v9 = vmul.f32 %v3530_v33, %v2003_v43  ;;  %v2299_v43 = vrot.slane %v2298_v59, 1 }
 0x2f2   : > { %v2116_v51 = vsel %vm358_vm0, %v2040_v9, 0.0  ;;  %v2706_v9 = vrot.slane %v2705_v62, 1  ;;  %v2300_v45 = vadd.f32 %v2299_v43, %v2298_v59  ;;  %v2709_v43 = vrot.slane %v2708_v24, 4 }
 0x2f3   : > { %v2117_v4 = vrot.slane %v2116_v51, 4 }
 0x2f4   : > { %v4693_v17 = vpop.permute.xlu1 %2603  ;;  %v4716_v56 = vadd.f32 %v2706_v9, %v2705_v62  ;;  %v2710_v3 = vadd.f32 %v2709_v43, %v2708_v24 }
 0x2f5   : > { %v2118_v31 = vadd.f32 %v2117_v4, %v2116_v51  ;;  %v2697_v51 = vrot.slane %v2696_v58, 2  ;;  %v4707_v4 = vld [vmem:[%s3719_s12 + $0xe0] sm:$0xff] }
 0x2f6   : > { %v2236_v48 = vmul.f32 %v4707_v4, %v2216_v29  ;;  %v2141_v29 = vadd.f32 %v2140_v41, %v2139_v20  ;;  %v4737_v20 = vadd.f32 %v2542_v61, %v2541_v34 }
 0x2f7   : > { %v2119_v30 = vrot.slane %v2118_v31, 2  ;;  %v2698_v38 = vadd.f32 %v2697_v51, %v2696_v58  ;;  %v2521_v51 = vrot.slane %v2520_v49, 1 }
 0x2f8   : > { %v2204_v0 = vpop.permute.xlu1 %2203  ;;  %v2336_v23 = vsel %vm358_vm0, %v2236_v48, 0.0  ;;  %v4734_v48 = vadd.f32 %v2327_v42, %v2326_v25 }
 0x2f9   : > { %v2120_v33 = vadd.f32 %v2119_v30, %v2118_v31  ;;  %v2527_v31 = vadd.f32 %v2526_v11, %v2525_v32  ;;  %v2508_v30 = vadd.f32 %v2507_v36, %v2506_v39  ;;  %v2233_v22 = vmul.f32 %v4656_v50, %v2204_v0  ;;  %v3538_v0 = vld [vmem:[%s3719_s12 + $0xc8] sm:$0xff] }
 0x2fa   : > { %v2314_v32 = vadd.f32 %v2313_v47, %v2312_v7  ;;  %v2699_v59 = vrot.slane %v2698_v38, 1  ;;  %v2337_v55 = vrot.slane %v2336_v23, 4  ;;  %v2633_v7 = vmul.f32 %v4675_v13, %v4693_v17 }
 0x2fb   : > { %v2121_v27 = vrot.slane %v2120_v33, 1  ;;  %v2528_v58 = vrot.slane %v2527_v31, 1  ;;  %v2315_v50 = vsel %vm358_vm0, %v2233_v22, 0.0  ;;  %v2142_v13 = vrot.slane %v2141_v29, 1 }
 0x2fc   : > { %v2316_v21 = vrot.slane %v2315_v50, 4  ;;  %v2715_v47 = vsel %vm358_vm0, %v2633_v7, 0.0 }
 0x2fd   : > { %v2413_v14 = vpop.permute.xlu1 %2412  ;;  %v2122_v60 = vadd.f32 %v2121_v27, %v2120_v33  ;;  %v2045_v33 = vmul.f32 %v3537_v44, %v2028_v10  ;;  %v2515_v27 = vadd.f32 %v2514_v2, %v2513_v18  ;;  %v4727_v35 = vadd.f32 %v2528_v58, %v2527_v31 }
 0x2fe   : > { %v2442_v39 = vmul.f32 %v3538_v0, %v2413_v14  ;;  %v2317_v10 = vadd.f32 %v2316_v21, %v2315_v50  ;;  %v2716_v34 = vrot.slane %v2715_v47, 4 }
 0x2ff   : > { %v2781_v26 = vsel %vm2768_vm4, %v2122_v60, %v4662_v54  ;;  %v2305_v54 = vadd.f32 %v2304_v15, %v2303_v12  ;;  %v2151_v9 = vsel %vm358_vm0, %v2045_v33, 0.0  ;;  %v2338_v15 = vadd.f32 %v2337_v55, %v2336_v23 }
 0x300   : > { %v4714_v57 = vsel %vm2770_vm5, %v2129_v28, %v2781_v26  ;;  %v2220_v28 = vpop.permute.xlu0 %2219  ;;  %v2152_v26 = vrot.slane %v2151_v9, 4  ;;  %v2530_v36 = vsel %vm358_vm0, %v2442_v39, 0.0  ;;  %v2848_v53 = vsel %vm2766_vm3, %v2515_v27, %v2508_v30  ;;  %v3539_v39 = vld [vmem:[%s3719_s12 + $0xe8] sm:$0xff] }
 0x301   : > { %v2306_v62 = vrot.slane %v2305_v54, 1  ;;  %v2237_v19 = vmul.f32 %v3537_v44, %v2220_v28  ;;  %v2531_v40 = vrot.slane %v2530_v36, 4  ;;  %v2711_v23 = vrot.slane %v2710_v3, 2 }
 0x302   : > { %v4711_v8 = vpop.permute.xlu1 %2607  ;;  %v2153_v22 = vadd.f32 %v2152_v26, %v2151_v9  ;;  %v2143_v30 = vadd.f32 %v2142_v13, %v2141_v29  ;;  %v2318_v42 = vrot.slane %v2317_v10, 2  ;;  %v2717_v50 = vadd.f32 %v2716_v34, %v2715_v47 }
 0x303   : > { %v2307_v60 = vadd.f32 %v2306_v62, %v2305_v54  ;;  %v2339_v54 = vrot.slane %v2338_v15, 2  ;;  %v2343_v44 = vsel %vm358_vm0, %v2237_v19, 0.0 }
 0x305   : > { %v2812_v17 = vsel %vm2766_vm3, %v2307_v60, %v2300_v45  ;;  %v2634_v45 = vmul.f32 %v3538_v0, %v4711_v8  ;;  %v2340_v55 = vadd.f32 %v2339_v54, %v2338_v15  ;;  %v2344_v8 = vrot.slane %v2343_v44, 4 }
 0x306   : > { %v4743_v24 = vsel %vm2768_vm4, %v2314_v32, %v2812_v17  ;;  %v2154_v32 = vrot.slane %v2153_v22, 2  ;;  %v2319_v60 = vadd.f32 %v2318_v42, %v2317_v10 }
 0x307   : > { %v2013_v12 = vpop.permute.xlu1 %2012  ;;  %v2722_v0 = vsel %vm358_vm0, %v2634_v45, 0.0  ;;  %v2341_v26 = vrot.slane %v2340_v55, 1 }
 0x308   : > { %v2042_v6 = vmul.f32 %v4681_v16, %v2013_v12  ;;  %v4731_v16 = vadd.f32 %v2699_v59, %v2698_v38  ;;  %v2522_v38 = vadd.f32 %v2521_v51, %v2520_v49  ;;  %v2616_v12 = vpop.permute.xlu0 %2615  ;;  %v2155_v15 = vadd.f32 %v2154_v32, %v2153_v22 }
 0x309   : > { %v2723_v28 = vrot.slane %v2722_v0, 4  ;;  %v4767_v34 = vadd.f32 %v2341_v26, %v2340_v55 }
 0x30a   : > { %v2130_v52 = vsel %vm358_vm0, %v2042_v6, 0.0  ;;  %v2849_v62 = vsel %vm2768_vm4, %v2522_v38, %v2848_v53  ;;  %v2712_v6 = vadd.f32 %v2711_v23, %v2710_v3  ;;  %v2718_v53 = vrot.slane %v2717_v50, 2 }
 0x30b   : > { %v2131_v11 = vrot.slane %v2130_v52, 4  ;;  %v4761_v3 = vsel %vm2770_vm5, %v4727_v35, %v2849_v62  ;;  %v2156_v10 = vrot.slane %v2155_v15, 1 }
 0x30c   : > { %v2612_v14 = vpop.permute.xlu1 %2611  ;;  %v2713_v47 = vrot.slane %v2712_v6, 1  ;;  %v2719_v45 = vadd.f32 %v2718_v53, %v2717_v50 }
 0x30d   : > { %v2132_v18 = vadd.f32 %v2131_v11, %v2130_v52  ;;  %v2635_v58 = vmul.f32 %v4688_v63, %v2612_v14  ;;  %v2636_v63 = vmul.f32 %v3539_v39, %v2616_v12 }
 0x30e   : > { %v2714_v42 = vadd.f32 %v2713_v47, %v2712_v6 }
 0x30f   : > { %v2133_v31 = vrot.slane %v2132_v18, 2  ;;  %v2729_v29 = vsel %vm358_vm0, %v2635_v58, 0.0  ;;  %v2736_v13 = vsel %vm358_vm0, %v2636_v63, 0.0 }
 0x310   : > { %v2212_v2 = vpop.permute.xlu1 %2211 }
 0x311   : > { %v2134_v25 = vadd.f32 %v2133_v31, %v2132_v18  ;;  %v2235_v41 = vmul.f32 %v4699_v37, %v2212_v2  ;;  %v2532_v37 = vadd.f32 %v2531_v40, %v2530_v36  ;;  %v2345_v36 = vadd.f32 %v2344_v8, %v2343_v44 }
 0x312   : > { %v2730_v18 = vrot.slane %v2729_v29, 4  ;;  %v2320_v31 = vrot.slane %v2319_v60, 1  ;;  %v2724_v40 = vadd.f32 %v2723_v28, %v2722_v0 }
 0x313   : > { %v2135_v33 = vrot.slane %v2134_v25, 1  ;;  %v2329_v59 = vsel %vm358_vm0, %v2235_v41, 0.0  ;;  %v2533_v7 = vrot.slane %v2532_v37, 2  ;;  %v2346_v22 = vrot.slane %v2345_v36, 2 }
 0x314   : > { %v2330_v49 = vrot.slane %v2329_v59, 4  ;;  %v2731_v41 = vadd.f32 %v2730_v18, %v2729_v29  ;;  %v2321_v58 = vadd.f32 %v2320_v31, %v2319_v60  ;;  %v2720_v29 = vrot.slane %v2719_v45, 1 }
 0x315   : > { %v2136_v27 = vadd.f32 %v2135_v33, %v2134_v25  ;;  %v2423_v43 = vpop.permute.xlu1 %2422  ;;  %v2534_v38 = vadd.f32 %v2533_v7, %v2532_v37  ;;  %v2737_v25 = vrot.slane %v2736_v13, 4  ;;  %v2725_v37 = vrot.slane %v2724_v40, 2 }
 0x316   : > { %v2444_v61 = vmul.f32 %v3539_v39, %v2423_v43  ;;  %v2331_v9 = vadd.f32 %v2330_v49, %v2329_v59  ;;  %v2347_v43 = vadd.f32 %v2346_v22, %v2345_v36  ;;  %v2732_v0 = vrot.slane %v2731_v41, 2 }
 0x317   : > { %v2783_v52 = vsel %vm2772_vm6, %v2136_v27, %v4714_v57  ;;  %v2535_v59 = vrot.slane %v2534_v38, 1  ;;  %v2157_v27 = vadd.f32 %v2156_v10, %v2155_v15  ;;  %v2738_v8 = vadd.f32 %v2737_v25, %v2736_v13 }
 0x318   : > { %v2544_v11 = vsel %vm358_vm0, %v2444_v61, 0.0  ;;  %v4757_v51 = vsel %vm2774_vm7, %v2143_v30, %v2783_v52  ;;  %v2332_v17 = vrot.slane %v2331_v9, 2  ;;  %v2726_v6 = vadd.f32 %v2725_v37, %v2724_v40 }
 0x319   : > { %v2545_v21 = vrot.slane %v2544_v11, 4  ;;  %v2023_v14 = vpop.permute.xlu1 %2022  ;;  %v2536_v52 = vadd.f32 %v2535_v59, %v2534_v38  ;;  %v2348_v28 = vrot.slane %v2347_v43, 1 }
 0x31a   : > { %v2044_v57 = vmul.f32 %v4707_v4, %v2023_v14  ;;  %v3540_v4 = vld [vmem:[%s3719_s12 + $0xf8] sm:$0xff]  ;;  %v2333_v44 = vadd.f32 %v2332_v17, %v2331_v9  ;;  %v2814_v9 = vsel %vm2770_vm5, %v2321_v58, %v4743_v24  ;;  %v2733_v14 = vadd.f32 %v2732_v0, %v2731_v41  ;;  %s3607_s12 = smov 96  }
 0x31b   : > { %v2546_v19 = vadd.f32 %v2545_v21, %v2544_v11  ;;  %v2739_v21 = vrot.slane %v2738_v8, 2  ;;  %v2851_v24 = vsel %vm2772_vm6, %v2536_v52, %v4761_v3  ;;  %v2727_v47 = vrot.slane %v2726_v6, 1 }
 0x31c   : > { %v2144_v54 = vsel %vm358_vm0, %v2044_v57, 0.0  ;;  %v2334_v61 = vrot.slane %v2333_v44, 1  ;;  %v2734_v10 = vrot.slane %v2733_v14, 1  ;;  %v2852_v3 = vsel %vm2774_vm7, %v4737_v20, %v2851_v24 }
 0x31d   : > { %v2547_v35 = vrot.slane %v2546_v19, 2  ;;  %v2145_v2 = vrot.slane %v2144_v54, 4  ;;  %v2428_v23 = vpop.permute.xlu1 %2427 }
 0x31e   : > { %v2445_v30 = vmul.f32 %v3540_v4, %v2428_v23  ;;  %v2335_v18 = vadd.f32 %v2334_v61, %v2333_v44  ;;  %v2740_v23 = vadd.f32 %v2739_v21, %v2738_v8  ;;  %v2728_v44 = vadd.f32 %v2727_v47, %v2726_v6 }
 0x31f   : > { %v2146_v33 = vadd.f32 %v2145_v2, %v2144_v54  ;;  %v2548_v62 = vadd.f32 %v2547_v35, %v2546_v19  ;;  %v2815_v19 = vsel %vm2772_vm6, %v4734_v48, %v2814_v9  ;;  %v2721_v48 = vadd.f32 %v2720_v29, %v2719_v45 }
 0x320   : > { %v2551_v12 = vsel %vm358_vm0, %v2445_v30, 0.0  ;;  %v2816_v25 = vsel %vm2774_vm7, %v2335_v18, %v2815_v19  ;;  %v2735_v58 = vadd.f32 %v2734_v10, %v2733_v14  ;;  %v2741_v37 = vrot.slane %v2740_v23, 1 }
 0x321   : > { %v2147_v49 = vrot.slane %v2146_v33, 2  ;;  %v2552_v32 = vrot.slane %v2551_v12, 4  ;;  %v2549_v60 = vrot.slane %v2548_v62, 1  ;;  %v2817_v20 = vsel %vm2776_vm8, %v4767_v34, %v2816_v25 }
 0x322   : > { %v2588_v39 = vpop.permute.xlu1 %2587 }
 0x323   : > { %v2148_v55 = vadd.f32 %v2147_v49, %v2146_v33  ;;  %v2553_v63 = vadd.f32 %v2552_v32, %v2551_v12  ;;  %v2629_v50 = vmul.f32 %v4592_v46, %v2588_v39  ;;  %v2550_v13 = vadd.f32 %v2549_v60, %v2548_v62 }
 0x324   : > { %v2349_v12 = vadd.f32 %v2348_v28, %v2347_v43 }
 0x325   : > { %v2149_v7 = vrot.slane %v2148_v55, 1  ;;  %v2554_v11 = vrot.slane %v2553_v63, 2  ;;  %v2687_v15 = vsel %vm358_vm0, %v2629_v50, 0.0  ;;  %v2853_v30 = vsel %vm2776_vm8, %v2550_v13, %v2852_v3 }
 0x326   : > { %v2688_v26 = vrot.slane %v2687_v15, 4  ;;  %v2620_v36 = vpop.permute.xlu1 %2619 }
 0x327   : > { %v2150_v57 = vadd.f32 %v2149_v7, %v2148_v55  ;;  %v2555_v53 = vadd.f32 %v2554_v11, %v2553_v63  ;;  %v2637_v46 = vmul.f32 %v3540_v4, %v2620_v36 }
 0x328   : > { %v2689_v17 = vadd.f32 %v2688_v26, %v2687_v15 }
 0x329   : > { %v2556_v31 = vrot.slane %v2555_v53, 1  ;;  %v2743_v38 = vsel %vm358_vm0, %v2637_v46, 0.0  ;;  %v2785_v54 = vsel %vm2776_vm8, %v2150_v57, %v4757_v51  ;;  %v2884_v51 = vsel %vm2766_vm3, %v4716_v56, %v4731_v16 }
 0x32a   : > { %v2690_v40 = vrot.slane %v2689_v17, 2  ;;  %v2744_v35 = vrot.slane %v2743_v38, 4  ;;  %v2786_v2 = vsel %vm2778_vm9, %v2157_v27, %v2785_v54  ;;  %v2885_v45 = vsel %vm2768_vm4, %v2714_v42, %v2884_v51 }
 0x32b   : > { %v2557_v22 = vadd.f32 %v2556_v31, %v2555_v53  ;;  %v2886_v49 = vsel %vm2770_vm5, %v2721_v48, %v2885_v45  ;;  %v2818_v16 = vsel %vm2778_vm9, %v2349_v12, %v2817_v20  ;;  %v2742_v42 = vadd.f32 %v2741_v37, %v2740_v23 }
 0x32c   : > { %v2691_v41 = vadd.f32 %v2690_v40, %v2689_v17  ;;  %v2745_v4 = vadd.f32 %v2744_v35, %v2743_v38  ;;  %v2887_v27 = vsel %vm2772_vm6, %v2728_v44, %v2886_v49 }
 0x32d   : > { %v2854_v33 = vsel %vm2778_vm9, %v2557_v22, %v2853_v30  ;;  %v2888_v34 = vsel %vm2774_vm7, %v2735_v58, %v2887_v27 }
 0x32e   : > { %v2692_v59 = vrot.slane %v2691_v41, 1  ;;  %v2746_v62 = vrot.slane %v2745_v4, 2  ;;  %2857 = vrot.lane.b32.xlu1 %v2854_v33, %s3605_s20  ;;  %v2889_v39 = vsel %vm2776_vm8, %v2742_v42, %v2888_v34 }
 0x330   : > { %v2747_v32 = vadd.f32 %v2746_v62, %v2745_v4  ;;  %v2693_v56 = vadd.f32 %v2692_v59, %v2691_v41 }
 0x332   : > { %v2748_v8 = vrot.slane %v2747_v32, 1  ;;  %2821 = vrot.lane.b32.xlu1 %v2818_v16, %s3606_s26  ;;  %v2883_v0 = vsel %vm2778_vm9, %v2693_v56, %v4636_v5 }
 0x333   : > { %2891 = vrot.lane.b32.xlu0 %v2883_v0, %s3607_s12 }
 0x334   : > { %v2749_v43 = vadd.f32 %v2748_v8, %v2747_v32 }
 0x336   : > { %v2890_v61 = vsel %vm2778_vm9, %v2749_v43, %v2889_v39 }
 0x337   : > { %2893 = vrot.lane.b32.xlu1 %v2890_v61, %s3607_s12 }
 0x33d   : > { %v2856_v55 = vpop.permute.xlu0 %2855 }
 0x34b   : > { %v2820_v63 = vpop.permute.xlu0 %2819 }
 0x34c   : > { %v2897_v5 = vsel %vm358_vm0, %v4647_v1, %v2820_v63 }
 0x34d   : > { %v2899_v9 = vsel %vm727_vm1, %v2897_v5, %v2856_v55 }
 0x3a0   : > { %v2858_v50 = vpop.permute.xlu1 %2857 }
 0x3a4   : > { %v2822_v29 = vpop.permute.xlu1 %2821 }
 0x3a5   : > { %v2892_v52 = vpop.permute.xlu0 %2891  ;;  %v2898_v60 = vsel %vm358_vm0, %v2786_v2, %v2822_v29 }
 0x3a6   : > { %v2902_v6 = vsel %vm2901_vm10, %v2899_v9, %v2892_v52  ;;  %v2900_v1 = vsel %vm727_vm1, %v2898_v60, %v2858_v50 }
 0x3a7   : > { %2904 = vst [vmem:[%s285_s9] sm:$0xff] %v2902_v6 }
 0x3a9   : > { %v2894_v7 = vpop.permute.xlu1 %2893 }
 0x3aa   : > { %v2903_v11 = vsel %vm2901_vm10, %v2900_v1, %v2894_v7 }
 0x3ab   : > { %2905 = vst [vmem:[%s285_s9 + $0x8] sm:$0xff] %v2903_v11 }
 0x3ac   : > { %3554 = shalt.err (!%p3551_p4)
}
 0x3ad   : > { %s3555_s20 = scalar_lea.hbm %s4815_s15, 256  ;;  %s3559_s28 = scalar_lea.hbm %s4863_s6, 512 }
 0x3ae   : > { %p3556_p7 = scmp.ne.s32.totalorder %s4815_s15, %s3555_s20  ;;  %p3560_p10 = scmp.lt.s32.totalorder %s4815_s15, %s4863_s6 }
 0x3af   : > { %p3561_p11 = scmp.lt.s32.totalorder %s3559_s28, %s3555_s20 }
 0x3b0   : > { %p3557_p8 = pnand %p3556_p7, %p3684_p5 }
 0x3b1   : > { %p3562_p12 = por %p3561_p11, %p3560_p10 }
 0x3b2   : > { %p3558_p9 = pneg %p3557_p8 }
 0x3b4   : > { %p3563_p13 = pnand %p3562_p12, %p3558_p9 }
 0x3b6   : > { %3566 = shalt.err (!%p3563_p13)
}
 0x3b7   : > { %s3609_s11 = smov 128   ;;  %s3610_s13 = smov 8  }
 0x3b8   : > { %3287 = dma.vmem_to_hbm [thread:$0]  (%p3684_p5), %s4809_s10, 256, %s4815_s15, %s4817_s16, %s3609_s11, %s3609_s11, %s3610_s13  }
 0x3b9 PF: > { %p3293_p0 = scmp.ge.s32.totalorder %s3601_s24, 2  ;;  %s2935_s14 = sand.u32 1, %s3589_s21  }
 0x3ba   : > { %s2936_s17 = scalar_lea.sflag [#allocation3], %s2935_s14 }
 0x3bb   : > { %p3290_p1 = pnand %p3293_p0, %p3688_p6 }
 0x3bd   : > { %p3291_p2 = pneg %p3290_p1 }
 0x3bf   : > { %3584 = dma.done.wait (%p3291_p2), %s2936_s17, 256  }
 0x3c0   : > { %3586 = vsyncadd (%p3291_p2), %s2936_s17, 4294967040  ;;  %p16_p3 = scmp.ge.s32.totalorder %s3671_s27, 4   ;;  %s4878_s21 = smov %s3593_s22 }
 0x3c1   : > { %s4879_s22 = smov %s3597_s23  ;;  %s4880_s23 = smov %s3682_s30 }
 0x3c2   : > { %s4881_s24 = smov %s3671_s27  ;;  %18 = sbr.rel (!%p16_p3) target bundleno = 3 (0x3), region = 82 }
 0x3c7   :  { %2941 = vsyncpa [#allocation3], 1 }
 0x3c8   :  { %2943 = vsyncpa [#allocation3 + $0x1], 1 }

</bundles_post_ra>
